<compile_context>
chip_gen: v7x
topology: tpu7x:2x2x1
jax: 0.10.0
libtpu: 0.0.40
codegen_flags: <defaults>
</compile_context>

<pallas_src>
import jax
import jax.numpy as jnp
from jax.experimental import pallas as pl
from jax.experimental.pallas import tpu as pltpu


NEGATIVE_SLOPE = -0.1  # matches the PyTorch module (sign-flipping slope)


def _convt_leaky_kernel(s_ref, w_ref, b_ref, x_ref, o_ref):
    """One (n, h-tile) block.

    s_ref: (W, L)         0/1 lane-spread matrix, S[w, kw*w + e] = 1  (L = kw*W)
    w_ref: (Cin, R, L)    parity weights, w[ci, co*kh+i, kw*w + j] = W[ci,co,i,j]
    b_ref: (R, L)         bias rows, b[co*kh+i, :] = bias[co]
    x_ref: (Cin, TH, W)   input tile (batch dim squeezed away)
    o_ref: (Cout, TH, kh*L)  output tile, flat-compatible with NCHW
    """
    Cin, TH, W = x_ref.shape
    R, L = b_ref.shape
    Cout = o_ref.shape[0]
    kh = R // Cout

    S = s_ref[...]
    # Lane-spread each input channel: xs[ci][h, kw*w + e] = x[ci, h, w].
    # Exact: S is 0/1 and HIGHEST precision keeps full f32 on the MXU.
    xs = [
        jnp.dot(
            x_ref[ci],
            S,
            precision=jax.lax.Precision.HIGHEST,
            preferred_element_type=jnp.float32,
        )
        for ci in range(Cin)
    ]

    # Channel contraction on the VPU: 4 broadcast-FMAs over the whole
    # (R, TH, L) tile; the kw selection is already in the lane-varying weights.
    acc = b_ref[...][:, None, :] + w_ref[0][:, None, :] * xs[0][None, :, :]
    for ci in range(1, Cin):
        acc = acc + w_ref[ci][:, None, :] * xs[ci][None, :, :]

    out = jnp.where(acc > 0, acc, acc * NEGATIVE_SLOPE)  # (R, TH, L)

    # Place the (co, i) plane at lanes [i*L, (i+1)*L) of output channel co.
    for co in range(Cout):
        for i in range(kh):
            o_ref[co, :, i * L:(i + 1) * L] = out[co * kh + i]


def _pick_row_tile(h, n):
    """Largest convenient h-tile that divides H; ensure >=2 grid steps."""
    th = h
    for cand in (128, 64, 32, 16, 8):
        if h % cand == 0:
            th = cand
            break
    # Give the two v7x TensorCores something to shard (no-op on v5e/v6e).
    while n * (h // th) < 2 and th % 2 == 0 and th >= 16:
        th //= 2
    return th


@jax.jit
def conv_transpose2d_leaky(x, weight, bias):
    """x: (N, Cin, H, W); weight: (Cin, Cout, 2, 2); bias: (Cout,). NCHW out."""
    N, Cin, H, W = x.shape
    Cin_w, Cout, kh, kw = weight.shape
    assert Cin == Cin_w and kh == 2 and kw == 2

    L = kw * W          # lanes per (h, i) output row
    R = Cout * kh
    TH = _pick_row_tile(H, N)

    # Tiny weight-derived constants (a few KB).
    iota_l = jax.lax.broadcasted_iota(jnp.int32, (W, L), 1)
    iota_w = jax.lax.broadcasted_iota(jnp.int32, (W, L), 0)
    spread = (iota_l // kw == iota_w).astype(jnp.float32)            # (W, L)
    w_par = jnp.tile(weight, (1, 1, 1, W)).reshape(Cin, R, L)         # (Cin, R, L)
    b_par = jnp.broadcast_to(bias[:, None, None], (Cout, kh, L)).reshape(R, L)

    grid = (N, H // TH)

    out = pl.pallas_call(
        _convt_leaky_kernel,
        out_shape=jax.ShapeDtypeStruct((N, Cout, H, kh * L), jnp.float32),
        grid=grid,
        in_specs=[
            pl.BlockSpec((W, L), lambda n, m: (0, 0)),                 # spread S
            pl.BlockSpec((Cin, R, L), lambda n, m: (0, 0, 0)),         # parity W
            pl.BlockSpec((R, L), lambda n, m: (0, 0)),                 # bias rows
            pl.BlockSpec((None, Cin, TH, W), lambda n, m: (n, 0, m, 0)),  # x tile
        ],
        out_specs=pl.BlockSpec(
            (None, Cout, TH, kh * L), lambda n, m: (n, 0, m, 0)
        ),
        compiler_params=pltpu.CompilerParams(
            dimension_semantics=("parallel", "parallel")
        ),
    )(spread, w_par, b_par, x)

    # (N, Cout, H, kh*kw*W) and (N, Cout, kh*H, kw*W) have identical row-major
    # flattening, so this reshape is a free bitcast (no extra HBM pass).
    return out.reshape(N, Cout, kh * H, kw * W)


def _reference(x, weight, bias):
    # out[n,co,2h+i,2w+j] = sum_ci x[n,ci,h,w]*W[ci,co,i,j] + b[co], then leaky.
    N, Cin, H, W = x.shape
    _, Cout, kh, kw = weight.shape
    y = jnp.einsum(
        "nchw,cokl->nohkwl", x, weight, precision=jax.lax.Precision.HIGHEST
    )
    y = y.reshape(N, Cout, H * kh, W * kw) + bias[None, :, None, None]
    return jnp.where(y > 0, y, y * NEGATIVE_SLOPE)


if __name__ == "__main__":
    key = jax.random.PRNGKey(0)
    k_x, k_w, k_b = jax.random.split(key, 3)

    N, Cin, H, W = 2, 4, 16, 16
    Cout, kh, kw = 7, 2, 2

    x = jax.random.normal(k_x, (N, Cin, H, W), dtype=jnp.float32)
    # PyTorch-style init scale: U(-1/sqrt(fan), 1/sqrt(fan))
    fan = Cin * kh * kw
    bound = 1.0 / (fan ** 0.5)
    weight = jax.random.uniform(
        k_w, (Cin, Cout, kh, kw), minval=-bound, maxval=bound, dtype=jnp.float32
    )
    bias = jax.random.uniform(
        k_b, (Cout,), minval=-bound, maxval=bound, dtype=jnp.float32
    )

    out = jax.block_until_ready(conv_transpose2d_leaky(x, weight, bias))
    ref = _reference(x, weight, bias)

    assert out.shape == (N, Cout, H * 2, W * 2), out.shape
    assert jnp.allclose(out, ref, atol=1e-5, rtol=1e-5), float(
        jnp.max(jnp.abs(out - ref))
    )

    print("KERNEL_OK")
</pallas_src>

<mosaic_0001>
module attributes {stable_mosaic.version = 11 : i64} {
  func.func @_convt_leaky_kernel(%arg0: i32, %arg1: i32, %arg2: memref<16x32xf32, #tpu.memory_space<vmem>>, %arg3: memref<4x14x32xf32, #tpu.memory_space<vmem>>, %arg4: memref<14x32xf32, #tpu.memory_space<vmem>>, %arg5: memref<1x4x16x16xf32, #tpu.memory_space<vmem>>, %arg6: memref<1x7x16x64xf32, #tpu.memory_space<vmem>>) attributes {dimension_semantics = [#tpu.dimension_semantics<parallel>, #tpu.dimension_semantics<parallel>], iteration_bounds = array<i64: 2, 1>, scalar_prefetch = 0 : i64, scratch_operands = 0 : i64, tpu.core_type = #tpu.core_type<tc>, window_params = [{pipeline_mode = #tpu.pipeline_mode<synchronous>, transform_indices = @transform_0, window_bounds = array<i64: 16, 32>}, {pipeline_mode = #tpu.pipeline_mode<synchronous>, transform_indices = @transform_1, window_bounds = array<i64: 4, 14, 32>}, {pipeline_mode = #tpu.pipeline_mode<synchronous>, transform_indices = @transform_2, window_bounds = array<i64: 14, 32>}, {transform_indices = @transform_3, window_bounds = array<i64: 1, 4, 16, 16>}, {transform_indices = @transform_4, window_bounds = array<i64: 1, 7, 16, 64>}]} {
    %c0 = arith.constant 0 : index
    %c0_0 = arith.constant 0 : index
    %0 = vector.load %arg2[%c0, %c0_0] : memref<16x32xf32, #tpu.memory_space<vmem>>, vector<16x32xf32>
    %c0_1 = arith.constant 0 : index
    %c0_2 = arith.constant 0 : index
    %c0_3 = arith.constant 0 : index
    %c0_4 = arith.constant 0 : index
    %1 = vector.load %arg5[%c0_1, %c0_2, %c0_3, %c0_4] : memref<1x4x16x16xf32, #tpu.memory_space<vmem>>, vector<1x1x16x16xf32>
    %2 = vector.shape_cast %1 : vector<1x1x16x16xf32> to vector<16x16xf32>
    %cst = arith.constant dense<0.000000e+00> : vector<16x32xf32>
    %3 = tpu.matmul %2, %0, %cst {dimension_numbers = #tpu.dot_dimension_numbers<[1], [0], [0], [1], [0, 0, 1, 1], [], []>, precision = #tpu.contract_precision<fp32>} : vector<16x16xf32>, vector<16x32xf32>, vector<16x32xf32> -> vector<16x32xf32>
    %c0_5 = arith.constant 0 : index
    %c1 = arith.constant 1 : index
    %c0_6 = arith.constant 0 : index
    %c0_7 = arith.constant 0 : index
    %4 = vector.load %arg5[%c0_5, %c1, %c0_6, %c0_7] : memref<1x4x16x16xf32, #tpu.memory_space<vmem>>, vector<1x1x16x16xf32>
    %5 = vector.shape_cast %4 : vector<1x1x16x16xf32> to vector<16x16xf32>
    %cst_8 = arith.constant dense<0.000000e+00> : vector<16x32xf32>
    %6 = tpu.matmul %5, %0, %cst_8 {dimension_numbers = #tpu.dot_dimension_numbers<[1], [0], [0], [1], [0, 0, 1, 1], [], []>, precision = #tpu.contract_precision<fp32>} : vector<16x16xf32>, vector<16x32xf32>, vector<16x32xf32> -> vector<16x32xf32>
    %c0_9 = arith.constant 0 : index
    %c2 = arith.constant 2 : index
    %c0_10 = arith.constant 0 : index
    %c0_11 = arith.constant 0 : index
    %7 = vector.load %arg5[%c0_9, %c2, %c0_10, %c0_11] : memref<1x4x16x16xf32, #tpu.memory_space<vmem>>, vector<1x1x16x16xf32>
    %8 = vector.shape_cast %7 : vector<1x1x16x16xf32> to vector<16x16xf32>
    %cst_12 = arith.constant dense<0.000000e+00> : vector<16x32xf32>
    %9 = tpu.matmul %8, %0, %cst_12 {dimension_numbers = #tpu.dot_dimension_numbers<[1], [0], [0], [1], [0, 0, 1, 1], [], []>, precision = #tpu.contract_precision<fp32>} : vector<16x16xf32>, vector<16x32xf32>, vector<16x32xf32> -> vector<16x32xf32>
    %c0_13 = arith.constant 0 : index
    %c3 = arith.constant 3 : index
    %c0_14 = arith.constant 0 : index
    %c0_15 = arith.constant 0 : index
    %10 = vector.load %arg5[%c0_13, %c3, %c0_14, %c0_15] : memref<1x4x16x16xf32, #tpu.memory_space<vmem>>, vector<1x1x16x16xf32>
    %11 = vector.shape_cast %10 : vector<1x1x16x16xf32> to vector<16x16xf32>
    %cst_16 = arith.constant dense<0.000000e+00> : vector<16x32xf32>
    %12 = tpu.matmul %11, %0, %cst_16 {dimension_numbers = #tpu.dot_dimension_numbers<[1], [0], [0], [1], [0, 0, 1, 1], [], []>, precision = #tpu.contract_precision<fp32>} : vector<16x16xf32>, vector<16x32xf32>, vector<16x32xf32> -> vector<16x32xf32>
    %c0_17 = arith.constant 0 : index
    %c0_18 = arith.constant 0 : index
    %13 = vector.load %arg4[%c0_17, %c0_18] : memref<14x32xf32, #tpu.memory_space<vmem>>, vector<14x32xf32>
    %14 = vector.shape_cast %13 : vector<14x32xf32> to vector<14x1x32xf32>
    %c0_19 = arith.constant 0 : index
    %c0_20 = arith.constant 0 : index
    %c0_21 = arith.constant 0 : index
    %15 = vector.load %arg3[%c0_19, %c0_20, %c0_21] : memref<4x14x32xf32, #tpu.memory_space<vmem>>, vector<1x14x32xf32>
    %16 = vector.shape_cast %15 : vector<1x14x32xf32> to vector<14x32xf32>
    %17 = vector.shape_cast %16 : vector<14x32xf32> to vector<14x1x32xf32>
    %18 = vector.shape_cast %3 : vector<16x32xf32> to vector<1x16x32xf32>
    %19 = vector.broadcast %17 : vector<14x1x32xf32> to vector<14x16x32xf32>
    %20 = vector.broadcast %18 : vector<1x16x32xf32> to vector<14x16x32xf32>
    %21 = arith.mulf %19, %20 : vector<14x16x32xf32>
    %22 = vector.broadcast %14 : vector<14x1x32xf32> to vector<14x16x32xf32>
    %23 = arith.addf %22, %21 : vector<14x16x32xf32>
    %c1_22 = arith.constant 1 : index
    %c0_23 = arith.constant 0 : index
    %c0_24 = arith.constant 0 : index
    %24 = vector.load %arg3[%c1_22, %c0_23, %c0_24] : memref<4x14x32xf32, #tpu.memory_space<vmem>>, vector<1x14x32xf32>
    %25 = vector.shape_cast %24 : vector<1x14x32xf32> to vector<14x32xf32>
    %26 = vector.shape_cast %25 : vector<14x32xf32> to vector<14x1x32xf32>
    %27 = vector.shape_cast %6 : vector<16x32xf32> to vector<1x16x32xf32>
    %28 = vector.broadcast %26 : vector<14x1x32xf32> to vector<14x16x32xf32>
    %29 = vector.broadcast %27 : vector<1x16x32xf32> to vector<14x16x32xf32>
    %30 = arith.mulf %28, %29 : vector<14x16x32xf32>
    %31 = arith.addf %23, %30 : vector<14x16x32xf32>
    %c2_25 = arith.constant 2 : index
    %c0_26 = arith.constant 0 : index
    %c0_27 = arith.constant 0 : index
    %32 = vector.load %arg3[%c2_25, %c0_26, %c0_27] : memref<4x14x32xf32, #tpu.memory_space<vmem>>, vector<1x14x32xf32>
    %33 = vector.shape_cast %32 : vector<1x14x32xf32> to vector<14x32xf32>
    %34 = vector.shape_cast %33 : vector<14x32xf32> to vector<14x1x32xf32>
    %35 = vector.shape_cast %9 : vector<16x32xf32> to vector<1x16x32xf32>
    %36 = vector.broadcast %34 : vector<14x1x32xf32> to vector<14x16x32xf32>
    %37 = vector.broadcast %35 : vector<1x16x32xf32> to vector<14x16x32xf32>
    %38 = arith.mulf %36, %37 : vector<14x16x32xf32>
    %39 = arith.addf %31, %38 : vector<14x16x32xf32>
    %c3_28 = arith.constant 3 : index
    %c0_29 = arith.constant 0 : index
    %c0_30 = arith.constant 0 : index
    %40 = vector.load %arg3[%c3_28, %c0_29, %c0_30] : memref<4x14x32xf32, #tpu.memory_space<vmem>>, vector<1x14x32xf32>
    %41 = vector.shape_cast %40 : vector<1x14x32xf32> to vector<14x32xf32>
    %42 = vector.shape_cast %41 : vector<14x32xf32> to vector<14x1x32xf32>
    %43 = vector.shape_cast %12 : vector<16x32xf32> to vector<1x16x32xf32>
    %44 = vector.broadcast %42 : vector<14x1x32xf32> to vector<14x16x32xf32>
    %45 = vector.broadcast %43 : vector<1x16x32xf32> to vector<14x16x32xf32>
    %46 = arith.mulf %44, %45 : vector<14x16x32xf32>
    %47 = arith.addf %39, %46 : vector<14x16x32xf32>
    %cst_31 = arith.constant 0.000000e+00 : f32
    %48 = vector.broadcast %cst_31 : f32 to vector<14x16x32xf32>
    %49 = arith.cmpf ogt, %47, %48 : vector<14x16x32xf32>
    %cst_32 = arith.constant -1.000000e-01 : f32
    %50 = vector.broadcast %cst_32 : f32 to vector<14x16x32xf32>
    %51 = arith.mulf %47, %50 : vector<14x16x32xf32>
    %52 = arith.select %49, %47, %51 : vector<14x16x32xi1>, vector<14x16x32xf32>
    %53 = vector.extract_strided_slice %52 {offsets = [0, 0, 0], sizes = [1, 16, 32], strides = [1, 1, 1]} : vector<14x16x32xf32> to vector<1x16x32xf32>
    %54 = vector.shape_cast %53 : vector<1x16x32xf32> to vector<16x32xf32>
    %c0_33 = arith.constant 0 : index
    %c0_34 = arith.constant 0 : index
    %c0_35 = arith.constant 0 : index
    %c0_36 = arith.constant 0 : index
    %55 = vector.load %arg6[%c0_33, %c0_34, %c0_35, %c0_36] : memref<1x7x16x64xf32, #tpu.memory_space<vmem>>, vector<1x1x16x32xf32>
    %56 = vector.shape_cast %55 : vector<1x1x16x32xf32> to vector<16x32xf32>
    %57 = vector.shape_cast %54 : vector<16x32xf32> to vector<1x1x16x32xf32>
    tpu.vector_store %arg6[%c0_33, %c0_34, %c0_35, %c0_36], %57 {strides = array<i32>} : memref<1x7x16x64xf32, #tpu.memory_space<vmem>>, vector<1x1x16x32xf32>,
    %58 = vector.extract_strided_slice %52 {offsets = [1, 0, 0], sizes = [1, 16, 32], strides = [1, 1, 1]} : vector<14x16x32xf32> to vector<1x16x32xf32>
    %59 = vector.shape_cast %58 : vector<1x16x32xf32> to vector<16x32xf32>
    %c0_37 = arith.constant 0 : index
    %c0_38 = arith.constant 0 : index
    %c0_39 = arith.constant 0 : index
    %c32 = arith.constant 32 : index
    %60 = vector.load %arg6[%c0_37, %c0_38, %c0_39, %c32] : memref<1x7x16x64xf32, #tpu.memory_space<vmem>>, vector<1x1x16x32xf32>
    %61 = vector.shape_cast %60 : vector<1x1x16x32xf32> to vector<16x32xf32>
    %62 = vector.shape_cast %59 : vector<16x32xf32> to vector<1x1x16x32xf32>
    tpu.vector_store %arg6[%c0_37, %c0_38, %c0_39, %c32], %62 {strides = array<i32>} : memref<1x7x16x64xf32, #tpu.memory_space<vmem>>, vector<1x1x16x32xf32>,
    %63 = vector.extract_strided_slice %52 {offsets = [2, 0, 0], sizes = [1, 16, 32], strides = [1, 1, 1]} : vector<14x16x32xf32> to vector<1x16x32xf32>
    %64 = vector.shape_cast %63 : vector<1x16x32xf32> to vector<16x32xf32>
    %c0_40 = arith.constant 0 : index
    %c1_41 = arith.constant 1 : index
    %c0_42 = arith.constant 0 : index
    %c0_43 = arith.constant 0 : index
    %65 = vector.load %arg6[%c0_40, %c1_41, %c0_42, %c0_43] : memref<1x7x16x64xf32, #tpu.memory_space<vmem>>, vector<1x1x16x32xf32>
    %66 = vector.shape_cast %65 : vector<1x1x16x32xf32> to vector<16x32xf32>
    %67 = vector.shape_cast %64 : vector<16x32xf32> to vector<1x1x16x32xf32>
    tpu.vector_store %arg6[%c0_40, %c1_41, %c0_42, %c0_43], %67 {strides = array<i32>} : memref<1x7x16x64xf32, #tpu.memory_space<vmem>>, vector<1x1x16x32xf32>,
    %68 = vector.extract_strided_slice %52 {offsets = [3, 0, 0], sizes = [1, 16, 32], strides = [1, 1, 1]} : vector<14x16x32xf32> to vector<1x16x32xf32>
    %69 = vector.shape_cast %68 : vector<1x16x32xf32> to vector<16x32xf32>
    %c0_44 = arith.constant 0 : index
    %c1_45 = arith.constant 1 : index
    %c0_46 = arith.constant 0 : index
    %c32_47 = arith.constant 32 : index
    %70 = vector.load %arg6[%c0_44, %c1_45, %c0_46, %c32_47] : memref<1x7x16x64xf32, #tpu.memory_space<vmem>>, vector<1x1x16x32xf32>
    %71 = vector.shape_cast %70 : vector<1x1x16x32xf32> to vector<16x32xf32>
    %72 = vector.shape_cast %69 : vector<16x32xf32> to vector<1x1x16x32xf32>
    tpu.vector_store %arg6[%c0_44, %c1_45, %c0_46, %c32_47], %72 {strides = array<i32>} : memref<1x7x16x64xf32, #tpu.memory_space<vmem>>, vector<1x1x16x32xf32>,
    %73 = vector.extract_strided_slice %52 {offsets = [4, 0, 0], sizes = [1, 16, 32], strides = [1, 1, 1]} : vector<14x16x32xf32> to vector<1x16x32xf32>
    %74 = vector.shape_cast %73 : vector<1x16x32xf32> to vector<16x32xf32>
    %c0_48 = arith.constant 0 : index
    %c2_49 = arith.constant 2 : index
    %c0_50 = arith.constant 0 : index
    %c0_51 = arith.constant 0 : index
    %75 = vector.load %arg6[%c0_48, %c2_49, %c0_50, %c0_51] : memref<1x7x16x64xf32, #tpu.memory_space<vmem>>, vector<1x1x16x32xf32>
    %76 = vector.shape_cast %75 : vector<1x1x16x32xf32> to vector<16x32xf32>
    %77 = vector.shape_cast %74 : vector<16x32xf32> to vector<1x1x16x32xf32>
    tpu.vector_store %arg6[%c0_48, %c2_49, %c0_50, %c0_51], %77 {strides = array<i32>} : memref<1x7x16x64xf32, #tpu.memory_space<vmem>>, vector<1x1x16x32xf32>,
    %78 = vector.extract_strided_slice %52 {offsets = [5, 0, 0], sizes = [1, 16, 32], strides = [1, 1, 1]} : vector<14x16x32xf32> to vector<1x16x32xf32>
    %79 = vector.shape_cast %78 : vector<1x16x32xf32> to vector<16x32xf32>
    %c0_52 = arith.constant 0 : index
    %c2_53 = arith.constant 2 : index
    %c0_54 = arith.constant 0 : index
    %c32_55 = arith.constant 32 : index
    %80 = vector.load %arg6[%c0_52, %c2_53, %c0_54, %c32_55] : memref<1x7x16x64xf32, #tpu.memory_space<vmem>>, vector<1x1x16x32xf32>
    %81 = vector.shape_cast %80 : vector<1x1x16x32xf32> to vector<16x32xf32>
    %82 = vector.shape_cast %79 : vector<16x32xf32> to vector<1x1x16x32xf32>
    tpu.vector_store %arg6[%c0_52, %c2_53, %c0_54, %c32_55], %82 {strides = array<i32>} : memref<1x7x16x64xf32, #tpu.memory_space<vmem>>, vector<1x1x16x32xf32>,
    %83 = vector.extract_strided_slice %52 {offsets = [6, 0, 0], sizes = [1, 16, 32], strides = [1, 1, 1]} : vector<14x16x32xf32> to vector<1x16x32xf32>
    %84 = vector.shape_cast %83 : vector<1x16x32xf32> to vector<16x32xf32>
    %c0_56 = arith.constant 0 : index
    %c3_57 = arith.constant 3 : index
    %c0_58 = arith.constant 0 : index
    %c0_59 = arith.constant 0 : index
    %85 = vector.load %arg6[%c0_56, %c3_57, %c0_58, %c0_59] : memref<1x7x16x64xf32, #tpu.memory_space<vmem>>, vector<1x1x16x32xf32>
    %86 = vector.shape_cast %85 : vector<1x1x16x32xf32> to vector<16x32xf32>
    %87 = vector.shape_cast %84 : vector<16x32xf32> to vector<1x1x16x32xf32>
    tpu.vector_store %arg6[%c0_56, %c3_57, %c0_58, %c0_59], %87 {strides = array<i32>} : memref<1x7x16x64xf32, #tpu.memory_space<vmem>>, vector<1x1x16x32xf32>,
    %88 = vector.extract_strided_slice %52 {offsets = [7, 0, 0], sizes = [1, 16, 32], strides = [1, 1, 1]} : vector<14x16x32xf32> to vector<1x16x32xf32>
    %89 = vector.shape_cast %88 : vector<1x16x32xf32> to vector<16x32xf32>
    %c0_60 = arith.constant 0 : index
    %c3_61 = arith.constant 3 : index
    %c0_62 = arith.constant 0 : index
    %c32_63 = arith.constant 32 : index
    %90 = vector.load %arg6[%c0_60, %c3_61, %c0_62, %c32_63] : memref<1x7x16x64xf32, #tpu.memory_space<vmem>>, vector<1x1x16x32xf32>
    %91 = vector.shape_cast %90 : vector<1x1x16x32xf32> to vector<16x32xf32>
    %92 = vector.shape_cast %89 : vector<16x32xf32> to vector<1x1x16x32xf32>
    tpu.vector_store %arg6[%c0_60, %c3_61, %c0_62, %c32_63], %92 {strides = array<i32>} : memref<1x7x16x64xf32, #tpu.memory_space<vmem>>, vector<1x1x16x32xf32>,
    %93 = vector.extract_strided_slice %52 {offsets = [8, 0, 0], sizes = [1, 16, 32], strides = [1, 1, 1]} : vector<14x16x32xf32> to vector<1x16x32xf32>
    %94 = vector.shape_cast %93 : vector<1x16x32xf32> to vector<16x32xf32>
    %c0_64 = arith.constant 0 : index
    %c4 = arith.constant 4 : index
    %c0_65 = arith.constant 0 : index
    %c0_66 = arith.constant 0 : index
    %95 = vector.load %arg6[%c0_64, %c4, %c0_65, %c0_66] : memref<1x7x16x64xf32, #tpu.memory_space<vmem>>, vector<1x1x16x32xf32>
    %96 = vector.shape_cast %95 : vector<1x1x16x32xf32> to vector<16x32xf32>
    %97 = vector.shape_cast %94 : vector<16x32xf32> to vector<1x1x16x32xf32>
    tpu.vector_store %arg6[%c0_64, %c4, %c0_65, %c0_66], %97 {strides = array<i32>} : memref<1x7x16x64xf32, #tpu.memory_space<vmem>>, vector<1x1x16x32xf32>,
    %98 = vector.extract_strided_slice %52 {offsets = [9, 0, 0], sizes = [1, 16, 32], strides = [1, 1, 1]} : vector<14x16x32xf32> to vector<1x16x32xf32>
    %99 = vector.shape_cast %98 : vector<1x16x32xf32> to vector<16x32xf32>
    %c0_67 = arith.constant 0 : index
    %c4_68 = arith.constant 4 : index
    %c0_69 = arith.constant 0 : index
    %c32_70 = arith.constant 32 : index
    %100 = vector.load %arg6[%c0_67, %c4_68, %c0_69, %c32_70] : memref<1x7x16x64xf32, #tpu.memory_space<vmem>>, vector<1x1x16x32xf32>
    %101 = vector.shape_cast %100 : vector<1x1x16x32xf32> to vector<16x32xf32>
    %102 = vector.shape_cast %99 : vector<16x32xf32> to vector<1x1x16x32xf32>
    tpu.vector_store %arg6[%c0_67, %c4_68, %c0_69, %c32_70], %102 {strides = array<i32>} : memref<1x7x16x64xf32, #tpu.memory_space<vmem>>, vector<1x1x16x32xf32>,
    %103 = vector.extract_strided_slice %52 {offsets = [10, 0, 0], sizes = [1, 16, 32], strides = [1, 1, 1]} : vector<14x16x32xf32> to vector<1x16x32xf32>
    %104 = vector.shape_cast %103 : vector<1x16x32xf32> to vector<16x32xf32>
    %c0_71 = arith.constant 0 : index
    %c5 = arith.constant 5 : index
    %c0_72 = arith.constant 0 : index
    %c0_73 = arith.constant 0 : index
    %105 = vector.load %arg6[%c0_71, %c5, %c0_72, %c0_73] : memref<1x7x16x64xf32, #tpu.memory_space<vmem>>, vector<1x1x16x32xf32>
    %106 = vector.shape_cast %105 : vector<1x1x16x32xf32> to vector<16x32xf32>
    %107 = vector.shape_cast %104 : vector<16x32xf32> to vector<1x1x16x32xf32>
    tpu.vector_store %arg6[%c0_71, %c5, %c0_72, %c0_73], %107 {strides = array<i32>} : memref<1x7x16x64xf32, #tpu.memory_space<vmem>>, vector<1x1x16x32xf32>,
    %108 = vector.extract_strided_slice %52 {offsets = [11, 0, 0], sizes = [1, 16, 32], strides = [1, 1, 1]} : vector<14x16x32xf32> to vector<1x16x32xf32>
    %109 = vector.shape_cast %108 : vector<1x16x32xf32> to vector<16x32xf32>
    %c0_74 = arith.constant 0 : index
    %c5_75 = arith.constant 5 : index
    %c0_76 = arith.constant 0 : index
    %c32_77 = arith.constant 32 : index
    %110 = vector.load %arg6[%c0_74, %c5_75, %c0_76, %c32_77] : memref<1x7x16x64xf32, #tpu.memory_space<vmem>>, vector<1x1x16x32xf32>
    %111 = vector.shape_cast %110 : vector<1x1x16x32xf32> to vector<16x32xf32>
    %112 = vector.shape_cast %109 : vector<16x32xf32> to vector<1x1x16x32xf32>
    tpu.vector_store %arg6[%c0_74, %c5_75, %c0_76, %c32_77], %112 {strides = array<i32>} : memref<1x7x16x64xf32, #tpu.memory_space<vmem>>, vector<1x1x16x32xf32>,
    %113 = vector.extract_strided_slice %52 {offsets = [12, 0, 0], sizes = [1, 16, 32], strides = [1, 1, 1]} : vector<14x16x32xf32> to vector<1x16x32xf32>
    %114 = vector.shape_cast %113 : vector<1x16x32xf32> to vector<16x32xf32>
    %c0_78 = arith.constant 0 : index
    %c6 = arith.constant 6 : index
    %c0_79 = arith.constant 0 : index
    %c0_80 = arith.constant 0 : index
    %115 = vector.load %arg6[%c0_78, %c6, %c0_79, %c0_80] : memref<1x7x16x64xf32, #tpu.memory_space<vmem>>, vector<1x1x16x32xf32>
    %116 = vector.shape_cast %115 : vector<1x1x16x32xf32> to vector<16x32xf32>
    %117 = vector.shape_cast %114 : vector<16x32xf32> to vector<1x1x16x32xf32>
    tpu.vector_store %arg6[%c0_78, %c6, %c0_79, %c0_80], %117 {strides = array<i32>} : memref<1x7x16x64xf32, #tpu.memory_space<vmem>>, vector<1x1x16x32xf32>,
    %118 = vector.extract_strided_slice %52 {offsets = [13, 0, 0], sizes = [1, 16, 32], strides = [1, 1, 1]} : vector<14x16x32xf32> to vector<1x16x32xf32>
    %119 = vector.shape_cast %118 : vector<1x16x32xf32> to vector<16x32xf32>
    %c0_81 = arith.constant 0 : index
    %c6_82 = arith.constant 6 : index
    %c0_83 = arith.constant 0 : index
    %c32_84 = arith.constant 32 : index
    %120 = vector.load %arg6[%c0_81, %c6_82, %c0_83, %c32_84] : memref<1x7x16x64xf32, #tpu.memory_space<vmem>>, vector<1x1x16x32xf32>
    %121 = vector.shape_cast %120 : vector<1x1x16x32xf32> to vector<16x32xf32>
    %122 = vector.shape_cast %119 : vector<16x32xf32> to vector<1x1x16x32xf32>
    tpu.vector_store %arg6[%c0_81, %c6_82, %c0_83, %c32_84], %122 {strides = array<i32>} : memref<1x7x16x64xf32, #tpu.memory_space<vmem>>, vector<1x1x16x32xf32>,
    return
  }
  func.func @transform_0(%arg0: i32, %arg1: i32) -> (i32, i32) {
    %c0_i32 = arith.constant 0 : i32
    %c0_i32_0 = arith.constant 0 : i32
    %c0_i32_1 = arith.constant 0 : i32
    return %c0_i32, %c0_i32_0 : i32, i32
  }
  func.func @transform_1(%arg0: i32, %arg1: i32) -> (i32, i32, i32) {
    %c0_i32 = arith.constant 0 : i32
    %c0_i32_0 = arith.constant 0 : i32
    %c0_i32_1 = arith.constant 0 : i32
    %c0_i32_2 = arith.constant 0 : i32
    return %c0_i32, %c0_i32_0, %c0_i32_1 : i32, i32, i32
  }
  func.func @transform_2(%arg0: i32, %arg1: i32) -> (i32, i32) {
    %c0_i32 = arith.constant 0 : i32
    %c0_i32_0 = arith.constant 0 : i32
    %c0_i32_1 = arith.constant 0 : i32
    return %c0_i32, %c0_i32_0 : i32, i32
  }
  func.func @transform_3(%arg0: i32, %arg1: i32) -> (i32, i32, i32, i32) {
    %c0_i32 = arith.constant 0 : i32
    %c0_i32_0 = arith.constant 0 : i32
    %c0_i32_1 = arith.constant 0 : i32
    return %arg0, %c0_i32, %arg1, %c0_i32_0 : i32, i32, i32, i32
  }
  func.func @transform_4(%arg0: i32, %arg1: i32) -> (i32, i32, i32, i32) {
    %c0_i32 = arith.constant 0 : i32
    %c0_i32_0 = arith.constant 0 : i32
    %c0_i32_1 = arith.constant 0 : i32
    return %arg0, %c0_i32, %arg1, %c0_i32_0 : i32, i32, i32, i32
  }
}

</mosaic_0001>

<bundles_post_ra>
// kernel: conv_transpose2d_leaky.1
= control target key start
LH: loop header
LB: loop body
LE: loop exit
PB: predicated region body
PF: predicated region fallthrough
CT: control target
= control target key end

     0   :  { %s4158_s15 = smov 0   ;;  %s4160_s16 = smov 0   ;;  %s5154_s0 = inlined_call_operand.vmem [shape: f32[16,32], index: 0, kind: input, shape index: {}]   ;;  %s5155_s1 = inlined_call_operand.vmem [shape: f32[4,14,32], index: 1, kind: input, shape index: {}]   ;;  %s5156_s2 = inlined_call_operand.vmem [shape: f32[14,32], index: 2, kind: input, shape index: {}]   ;;  %s5157_s3 = inlined_call_operand.vmem [shape: f32[2,4,16,16], index: 3, kind: input, shape index: {}]   ;;  %s5158_s4 = inlined_call_operand.vmem [shape: f32[2,7,16,64], index: 4, kind: output, shape index: {}]  }
   0x1   :  { %s4162_s17 = smov 0  }
   0x2 LB: > { %s26_s18 = sadd.s32 1, %s4125_s16  ;;  %p3627_p0 = scmp.ge.s32.totalorder %s4129_s17, 1  ;;  %s4129_s17 = sphi %s4162_s17, %s14_s17   ;;  %s4125_s16 = sphi %s4160_s16, %s5235_s16   ;;  %s4121_s15 = sphi %s4158_s15, %s5234_s15  }
   0x3   : > { %p28_p1 = scmp.ge.s32.totalorder %s26_s18, 2  ;;  %p183_p2 = scmp.lt.s32.totalorder %s4129_s17, 3 }
   0x5   : > { %s5237_s18 = smov (%p28_p1, %s26_s18), 0  ;;  %p184_p3 = pnand %p3627_p0, %p183_p2 }
   0x7   : > { %187 = sbr.rel (%p184_p3) target bundleno = 478 (0x1de), region = 36 }
   0xe   : > { %v237_v0 = vld [vmem:[%s5154_s0] sm:$0xff]  ;;  %v238_v1 = vld [vmem:[%s5154_s0 + $0x8] sm:$0xff]  ;;  %p218_p4 = scmp.lt.s32.totalorder %s4121_s15, 1  ;;  %vm241_vm0 = vcmask 130048   ;;  %s4132_s25 = smov 32   ;;  %vm3444_vm14 = vcmask 261120  }
   0xf   : > { %v249_v2 = vand.u32 4294901760, %v237_v0  ;;  %v252_v3 = vand.u32 4294901760, %v238_v1 }
  0x10   : > { %s5239_s15 = smov (!%p218_p4, %s4121_s15), 1 }
  0x11   : > { %v4184_v4 = vpack.c.bf16 %v252_v3, %v249_v2  ;;  %v4186_v5 = vsub.f32 %v237_v0, %v249_v2  ;;  %v4188_v6 = vsub.f32 %v238_v1, %v252_v3  ;;  %s3669_s23 = sshll.u32 %s5239_s15, 6 }
  0x12   : > { %s4196_s26 = scalar_lea.vmem %s5157_s3, %s3669_s23 }
  0x13   : > { %3935 = vmatprep.subr.bf16.mxu0 %v4184_v4  ;;  %3959 = vmatprep.subr.bf16.mxu1 %v4184_v4  ;;  %v338_v7 = vand.u32 4294901760, %v4186_v5  ;;  %v345_v8 = vand.u32 4294901760, %v4188_v6  ;;  %v239_v9 = vld [vmem:[%s4196_s26] sm:$0xff]  ;;  %v3631_v10 = vld [vmem:[%s4196_s26 + $0x10] sm:$0xff]  ;;  %v240_v11 = vld [vmem:[%s4196_s26 + $0x8] sm:$0xff]  ;;  %v4230_v42 = vpack.c.bf16 %v4188_v6, %v4186_v5 }
  0x14   : > { %3937 = vmatpush3.bf16.msra.mxu0 %v4184_v4  ;;  %3961 = vmatpush3.bf16.msra.mxu1 %v4184_v4  ;;  %v243_v12 = vsel %vm241_vm0, %v239_v9, 0  ;;  %v754_v15 = vsel %vm241_vm0, %v3631_v10, 0  ;;  %v3632_v16 = vld [vmem:[%s4196_s26 + $0x18] sm:$0xff]  ;;  %v246_v19 = vsel %vm241_vm0, %v240_v11, 0  ;;  %v3633_v44 = vld [vmem:[%s4196_s26 + $0x20] sm:$0xff]  ;;  %v3635_v45 = vld [vmem:[%s4196_s26 + $0x30] sm:$0xff]  ;;  %v2291_v11 = vlaneseq }
  0x15   : > { %v339_v13 = vsub.f32 %v4186_v5, %v338_v7  ;;  %v346_v14 = vsub.f32 %v4188_v6, %v345_v8  ;;  %v4210_v17 = vand.u32 4294901760, %v243_v12  ;;  %v4212_v18 = vand.u32 4294901760, %v754_v15  ;;  %v3634_v46 = vld [vmem:[%s4196_s26 + $0x28] sm:$0xff]  ;;  %v3636_v47 = vld [vmem:[%s4196_s26 + $0x38] sm:$0xff]  ;;  %s4070_s26 = smul.u32 112, %s5239_s15 }
  0x16   : > { %v757_v20 = vsel %vm241_vm0, %v3632_v16, 0  ;;  %v4216_v23 = vand.u32 4294901760, %v246_v19  ;;  %v4244_v43 = vpack.c.bf16 %v345_v8, %v338_v7  ;;  %v1265_v48 = vsel %vm241_vm0, %v3633_v44, 0  ;;  %v3637_v16 = vld [vmem:[%s5155_s1 + $0x10] sm:$0xff] }
  0x17   : > { %v340_v21 = vand.u32 4294901760, %v339_v13  ;;  %v347_v22 = vand.u32 4294901760, %v346_v14  ;;  %v4218_v24 = vand.u32 4294901760, %v757_v20  ;;  %v316_v25 = vsub.f32 %v243_v12, %v4210_v17  ;;  %s5036_s28 = scalar_lea.vmem %s5158_s4, %s4070_s26 }
  0x18   : > { %v827_v26 = vsub.f32 %v754_v15, %v4212_v18  ;;  %v326_v28 = vsub.f32 %v246_v19, %v4216_v23  ;;  %v1776_v49 = vsel %vm241_vm0, %v3635_v45, 0  ;;  %v1268_v50 = vsel %vm241_vm0, %v3634_v46, 0  ;;  %v2283_v15 = vld [vmem:[%s5156_s2] sm:$0xff] }
  0x19   : > { %v4222_v27 = vpack.c.bf16 %v347_v22, %v340_v21  ;;  %v837_v29 = vsub.f32 %v757_v20, %v4218_v24  ;;  %v317_v30 = vand.u32 4294901760, %v316_v25  ;;  %v1779_v51 = vsel %vm241_vm0, %v3636_v47, 0 }
  0x1a   : > { %v828_v31 = vand.u32 4294901760, %v827_v26  ;;  %v327_v32 = vand.u32 4294901760, %v326_v28  ;;  %v4258_v52 = vand.u32 4294901760, %v1265_v48  ;;  %v4260_v53 = vand.u32 4294901760, %v1776_v49 }
  0x1b   : > { %3939 = vmatprep.subr.bf16.mxu0 %v4222_v27  ;;  %v838_v33 = vand.u32 4294901760, %v837_v29  ;;  %3963 = vmatprep.subr.bf16.mxu1 %v4222_v27  ;;  %v318_v34 = vsub.f32 %v316_v25, %v317_v30  ;;  %v4262_v54 = vand.u32 4294901760, %v1268_v50  ;;  %v4264_v55 = vand.u32 4294901760, %v1779_v51 }
  0x1c   : > { %v829_v35 = vsub.f32 %v827_v26, %v828_v31  ;;  %v328_v36 = vsub.f32 %v326_v28, %v327_v32  ;;  %v1338_v56 = vsub.f32 %v1265_v48, %v4258_v52  ;;  %v1849_v57 = vsub.f32 %v1776_v49, %v4260_v53 }
  0x1d   : > { %v839_v37 = vsub.f32 %v837_v29, %v838_v33  ;;  %v319_v38 = vand.u32 4294901760, %v318_v34  ;;  %v1348_v58 = vsub.f32 %v1268_v50, %v4262_v54  ;;  %v1859_v59 = vsub.f32 %v1779_v51, %v4264_v55 }
  0x1e   : > { %v830_v39 = vand.u32 4294901760, %v829_v35  ;;  %v329_v40 = vand.u32 4294901760, %v328_v36  ;;  %v1339_v60 = vand.u32 4294901760, %v1338_v56  ;;  %v1850_v61 = vand.u32 4294901760, %v1849_v57 }
  0x1f   : > { %v840_v41 = vand.u32 4294901760, %v839_v37  ;;  %3770 = vmatprep.mubr.f32.mxu0 %v319_v38  ;;  %v1349_v62 = vand.u32 4294901760, %v1348_v58  ;;  %v1860_v63 = vand.u32 4294901760, %v1859_v59  ;;  %v4131_v9 = vmov 1966171168  }
  0x20   : > { %3812 = vmatprep.mubr.f32.mxu1 %v830_v39  ;;  %3771 = vmatmul.mubr.f32.vlgmr.msra.gmra.mrb[0].mxu0 %v329_v40  ;;  %v1340_v0 = vsub.f32 %v1338_v56, %v1339_v60  ;;  %v1851_v1 = vsub.f32 %v1849_v57, %v1850_v61  ;;  %v2289_v10 = vunpack.c.l.s4 %v4131_v9  ;;  %v2292_v13 = vshrl.u32 %v2291_v11, 7 }
  0x21   : > { %3813 = vmatmul.mubr.f32.vlgmr.msra.gmra.mrb[0].mxu1 %v840_v41  ;;  %3941 = vmatpush3.bf16.msra.mxu0 %v4222_v27  ;;  %v1350_v2 = vsub.f32 %v1348_v58, %v1349_v62  ;;  %v1861_v3 = vsub.f32 %v1859_v59, %v1860_v63  ;;  %v2684_v20 = vcombine.high %v3637_v16, %v3637_v16 }
  0x22   : > { %3965 = vmatpush3.bf16.msra.mxu1 %v4222_v27  ;;  %3777 = vmatprep.mubr.f32.mxu0 %v4210_v17  ;;  %v1341_v5 = vand.u32 4294901760, %v1340_v0  ;;  %v1852_v6 = vand.u32 4294901760, %v1851_v1  ;;  %v2290_v12 = vunpack.c.0.s8 %v2289_v10  ;;  %v4361_v48 = vsub.s32 0, %v2292_v13 }
  0x23   : > { %3943 = vmatprep.subr.bf16.mxu0 %v4230_v42  ;;  %3819 = vmatprep.mubr.f32.mxu1 %v4212_v18  ;;  %v1351_v7 = vand.u32 4294901760, %v1350_v2  ;;  %v1862_v8 = vand.u32 4294901760, %v1861_v3 }
  0x24   : > { %3967 = vmatprep.subr.bf16.mxu1 %v4230_v42  ;;  %v4320_v14 = vsub.s32 %v2290_v12, %v2292_v13  ;;  %5182 = vst [vmem:[#allocation3_spill] sm:$0xff] %v4361_v48 }
  0x26   : > { %5181 = vst [vmem:[#allocation2_spill] sm:$0xff] %v4320_v14  ;;  %v2691_v21 = vrot.slane %v3637_v16, %v4320_v14  ;;  %v2294_v22 = vrot.slane %v2283_v15, %v4320_v14 }
  0x28   : > { %3778 = vmatmul.mubr.f32.vlgmr.msra.gmra.mrb[0].mxu0 %v4216_v23  ;;  %v4354_v40 = vrot.slane %v2691_v21, %v4320_v14  ;;  %v4366_v51 = vrot.slane %v2294_v22, %v4320_v14 }
  0x29   : > { %3820 = vmatmul.mubr.f32.vlgmr.msra.gmra.mrb[0].mxu1 %v4218_v24  ;;  %3945 = vmatpush3.bf16.msra.mxu0 %v4230_v42 }
  0x2a   : > { %3969 = vmatpush3.bf16.msra.mxu1 %v4230_v42  ;;  %3784 = vmatprep.mubr.f32.mxu0 %v316_v25 }
  0x2b   : > { %3947 = vmatprep.subr.bf16.mxu0 %v4184_v4  ;;  %3826 = vmatprep.mubr.f32.mxu1 %v827_v26  ;;  %v2698_v26 = vrot.slane %v2684_v20, %v4320_v14  ;;  %v3639_v20 = vld [vmem:[%s5155_s1 + $0x20] sm:$0xff] }
  0x2c   : > { %3971 = vmatprep.subr.bf16.mxu1 %v4184_v4 }
  0x2d   : > { %v2700_v35 = vcombine.high %v2698_v26, %v2698_v26 }
  0x30   : > { %3785 = vmatmul.mubr.f32.vlgmr.msra.gmra.mrb[0].mxu0 %v326_v28  ;;  %v2284_v28 = vld [vmem:[%s5156_s2 + $0x8] sm:$0x3f] }
  0x31   : > { %3827 = vmatmul.mubr.f32.vlgmr.msra.gmra.mrb[0].mxu1 %v837_v29  ;;  %3949 = vmatpush3.bf16.msra.mxu0 %v4184_v4  ;;  %v2384_v29 = vld [vmem:[%s5155_s1 + $0x8] sm:$0x3f]  ;;  %v2343_v36 = vrot.slane %v2284_v28, %v4320_v14  ;;  %v2336_v45 = vcombine.high %v2284_v28, %v2284_v28 }
  0x32   : > { %3973 = vmatpush3.bf16.msra.mxu1 %v4184_v4  ;;  %3791 = vmatprep.mubr.f32.mxu0 %v317_v30  ;;  %v3638_v30 = vld [vmem:[%s5155_s1 + $0x18] sm:$0x3f]  ;;  %v2443_v37 = vrot.slane %v2384_v29, %v4320_v14 }
  0x33   : > { %3951 = vmatprep.subr.bf16.mxu0 %v4244_v43  ;;  %3833 = vmatprep.mubr.f32.mxu1 %v828_v31  ;;  %v2302_v31 = vcombine.high %v2294_v22, %v2294_v22  ;;  %v2740_v38 = vrot.slane %v3638_v30, %v4320_v14  ;;  %v2733_v46 = vcombine.high %v3638_v30, %v3638_v30 }
  0x34   : > { %3975 = vmatprep.subr.bf16.mxu1 %v4244_v43 }
  0x38   : > { %3792 = vmatmul.mubr.f32.vlgmr.msra.gmra.mrb[0].mxu0 %v327_v32 }
  0x39   : > { %3834 = vmatmul.mubr.f32.vlgmr.msra.gmra.mrb[0].mxu1 %v838_v33  ;;  %3953 = vmatpush3.bf16.msra.mxu0 %v4244_v43 }
  0x3a   : > { %3977 = vmatpush3.bf16.msra.mxu1 %v4244_v43  ;;  %3798 = vmatprep.mubr.f32.mxu0 %v4210_v17 }
  0x3b   : > { %3955 = vmatprep.subr.bf16.mxu0 %v4184_v4  ;;  %3840 = vmatprep.mubr.f32.mxu1 %v4212_v18 }
  0x3c   : > { %3979 = vmatprep.subr.bf16.mxu1 %v4184_v4 }
  0x40   : > { %3799 = vmatmul.mubr.f32.vlgmr.msra.gmra.mrb[0].mxu0 %v4216_v23 }
  0x41   : > { %3841 = vmatmul.mubr.f32.vlgmr.msra.gmra.mrb[0].mxu1 %v4218_v24  ;;  %3957 = vmatpush3.bf16.msra.mxu0 %v4184_v4 }
  0x42   : > { %3981 = vmatpush3.bf16.msra.mxu1 %v4184_v4  ;;  %3805 = vmatprep.mubr.f32.mxu0 %v4210_v17 }
  0x43   : > { %3847 = vmatprep.mubr.f32.mxu1 %v4212_v18  ;;  %3983 = vmatprep.subr.bf16.mxu0 %v4184_v4  ;;  %v2287_v18 = vcombine.high %v2283_v15, %v2283_v15 }
  0x44   : > { %4007 = vmatprep.subr.bf16.mxu1 %v4184_v4 }
  0x48   : > { %3806 = vmatmul.mubr.f32.vlgmr.msra.gmra.mrb[0].mxu0 %v4216_v23 }
  0x49   : > { %3848 = vmatmul.mubr.f32.vlgmr.msra.gmra.mrb[0].mxu1 %v4218_v24  ;;  %3985 = vmatpush3.bf16.msra.mxu0 %v4184_v4  ;;  %v2301_v24 = vrot.slane %v2287_v18, %v4320_v14 }
  0x4a   : > { %4009 = vmatpush3.bf16.msra.mxu1 %v4184_v4  ;;  %3854 = vmatprep.mubr.f32.mxu0 %v1341_v5 }
  0x4b   : > { %3987 = vmatprep.subr.bf16.mxu0 %v4222_v27  ;;  %3896 = vmatprep.mubr.f32.mxu1 %v1852_v6  ;;  %v2303_v33 = vcombine.high %v2301_v24, %v2301_v24 }
  0x4c   : > { %4011 = vmatprep.subr.bf16.mxu1 %v4222_v27  ;;  %3855 = vmatmul.mubr.f32.vlgmr.msra.gmra.mrb[2].mxu0 %v1351_v7 }
  0x4d   : > { %3897 = vmatmul.mubr.f32.vlgmr.msra.gmra.mrb[2].mxu1 %v1862_v8  ;;  %3989 = vmatpush3.bf16.msra.mxu0 %v4222_v27  ;;  %v2331_v49 = vrot.slane %v2303_v33, %v4320_v14  ;;  %v3641_v33 = vld [vmem:[%s5155_s1 + $0x30] sm:$0xff] }
  0x4e   : > { %4013 = vmatpush3.bf16.msra.mxu1 %v4222_v27  ;;  %3861 = vmatprep.mubr.f32.mxu0 %v4258_v52  ;;  %v2699_v27 = vcombine.high %v2691_v21, %v2691_v21  ;;  %v2359_v21 = vrot.slane %v2343_v36, %v4320_v14 }
  0x4f   : > { %3991 = vmatprep.subr.bf16.mxu0 %v4230_v42  ;;  %3903 = vmatprep.mubr.f32.mxu1 %v4260_v53  ;;  %v2335_v1 = vcombine.high %v2331_v49, %v2331_v49  ;;  %v4415_v16 = vrot.slane %v2331_v49, %v4361_v48 }
  0x50   : > { %4015 = vmatprep.subr.bf16.mxu1 %v4230_v42  ;;  %v2721_v41 = vrot.slane %v2699_v27, %v4320_v14  ;;  %v2756_v27 = vrot.slane %v2740_v38, %v4320_v14 }
  0x52   : > { %v4391_v3 = vrot.slane %v2721_v41, %v4361_v48 }
  0x54   : > { %3862 = vmatmul.mubr.f32.vlgmr.msra.gmra.mrb[2].mxu0 %v4262_v54 }
  0x55   : > { %3904 = vmatmul.mubr.f32.vlgmr.msra.gmra.mrb[2].mxu1 %v4264_v55  ;;  %3993 = vmatpush3.bf16.msra.mxu0 %v4230_v42 }
  0x56   : > { %4017 = vmatpush3.bf16.msra.mxu1 %v4230_v42  ;;  %3868 = vmatprep.mubr.f32.mxu0 %v1338_v56  ;;  %v2436_v42 = vcombine.high %v2384_v29, %v2384_v29  ;;  %v4369_v56 = vrot.slane %v2301_v24, %v4320_v14 }
  0x57   : > { %3995 = vmatprep.subr.bf16.mxu0 %v4184_v4  ;;  %3910 = vmatprep.mubr.f32.mxu1 %v1849_v57  ;;  %v2728_v57 = vrot.slane %v2700_v35, %v4320_v14 }
  0x58   : > { %4019 = vmatprep.subr.bf16.mxu1 %v4184_v4 }
  0x59   : > { %v2732_v10 = vcombine.high %v2728_v57, %v2728_v57 }
  0x5c   : > { %3869 = vmatmul.mubr.f32.vlgmr.msra.gmra.mrb[2].mxu0 %v1348_v58  ;;  %v4373_v58 = vrot.slane %v2436_v42, %v4320_v14 }
  0x5d   : > { %3911 = vmatmul.mubr.f32.vlgmr.msra.gmra.mrb[2].mxu1 %v1859_v59  ;;  %3997 = vmatpush3.bf16.msra.mxu0 %v4184_v4 }
  0x5e   : > { %4021 = vmatpush3.bf16.msra.mxu1 %v4184_v4  ;;  %3875 = vmatprep.mubr.f32.mxu0 %v1339_v60  ;;  %v4376_v60 = vrot.slane %v2698_v26, %v4320_v14  ;;  %v2452_v11 = vcombine.high %v4373_v58, %v4373_v58  ;;  %v2459_v26 = vrot.slane %v2443_v37, %v4320_v14 }
  0x5f   : > { %3999 = vmatprep.subr.bf16.mxu0 %v4244_v43  ;;  %3917 = vmatprep.mubr.f32.mxu1 %v1850_v61  ;;  %v4379_v61 = vrot.slane %v2336_v45, %v4320_v14 }
  0x60   : > { %4023 = vmatprep.subr.bf16.mxu1 %v4244_v43  ;;  %v2480_v28 = vrot.slane %v2452_v11, %v4320_v14 }
  0x61   : > { %v2352_v15 = vcombine.high %v4379_v61, %v4379_v61  ;;  %v2366_v45 = vrot.slane %v4379_v61, %v4320_v14 }
  0x64   : > { %3876 = vmatmul.mubr.f32.vlgmr.msra.gmra.mrb[2].mxu0 %v1349_v62  ;;  %v4382_v62 = vrot.slane %v2733_v46, %v4320_v14  ;;  %v2466_v46 = vrot.slane %v4373_v58, %v4320_v14 }
  0x65   : > { %3918 = vmatmul.mubr.f32.vlgmr.msra.gmra.mrb[2].mxu1 %v1860_v63  ;;  %4001 = vmatpush3.bf16.msra.mxu0 %v4244_v43 }
  0x66   : > { %4025 = vmatpush3.bf16.msra.mxu1 %v4244_v43  ;;  %3882 = vmatprep.mubr.f32.mxu0 %v4258_v52  ;;  %v2324_v43 = vrot.slane %v2302_v31, %v4320_v14  ;;  %v2380_v31 = vrot.slane %v2352_v15, %v4320_v14  ;;  %v2763_v49 = vrot.slane %v4382_v62, %v4320_v14 }
  0x67   : > { %4003 = vmatprep.subr.bf16.mxu0 %v4184_v4  ;;  %3924 = vmatprep.mubr.f32.mxu1 %v4260_v53 }
  0x68   : > { %4027 = vmatprep.subr.bf16.mxu1 %v4184_v4  ;;  %v2334_v59 = vcombine.high %v2324_v43, %v2324_v43  ;;  %v4408_v13 = vrot.slane %v2324_v43, %v4361_v48  ;;  %v2332_v43 = vcombine.high %v4366_v51, %v4366_v51 }
  0x6a   : > { %v4405_v12 = vrot.slane %v2334_v59, %v4361_v48  ;;  %v4496_v61 = vrot.slane %v2332_v43, %v4361_v48 }
  0x6c   : > { %3883 = vmatmul.mubr.f32.vlgmr.msra.gmra.mrb[2].mxu0 %v4262_v54 }
  0x6d   : > { %3925 = vmatmul.mubr.f32.vlgmr.msra.gmra.mrb[2].mxu1 %v4264_v55  ;;  %4005 = vmatpush3.bf16.msra.mxu0 %v4184_v4 }
  0x6e   : > { %4029 = vmatpush3.bf16.msra.mxu1 %v4184_v4  ;;  %3889 = vmatprep.mubr.f32.mxu0 %v4258_v52  ;;  %v2383_v4 = vld [vmem:[%s5155_s1] sm:$0xff]  ;;  %v2351_v52 = vcombine.high %v2343_v36, %v2343_v36 }
  0x6f   : > { %3931 = vmatprep.mubr.f32.mxu1 %v4260_v53  ;;  %v2394_v17 = vrot.slane %v2383_v4, %v4320_v14  ;;  %v2387_v19 = vcombine.high %v2383_v4, %v2383_v4  ;;  %v2451_v53 = vcombine.high %v2443_v37, %v2443_v37  ;;  %v2749_v4 = vcombine.high %v4382_v62, %v4382_v62 }
  0x70   : > { %v2373_v5 = vrot.slane %v2351_v52, %v4320_v14  ;;  %v2729_v37 = vcombine.high %v4354_v40, %v4354_v40  ;;  %v3138_v52 = vcombine.high %v3641_v33, %v3641_v33  ;;  %v2333_v62 = vcombine.high %v4369_v56, %v4369_v56 }
  0x71   : > { %v2402_v23 = vcombine.high %v2394_v17, %v2394_v17  ;;  %v2401_v25 = vrot.slane %v2387_v19, %v4320_v14  ;;  %v4351_v39 = vrot.slane %v2394_v17, %v4320_v14  ;;  %v2473_v6 = vrot.slane %v2451_v53, %v4320_v14 }
  0x72   : > { %v4418_v17 = vrot.slane %v2728_v57, %v4361_v48  ;;  %v4424_v19 = vrot.slane %v2335_v1, %v4361_v48  ;;  %v2382_v22 = vcombine.high %v2373_v5, %v2373_v5  ;;  %v4440_v30 = vrot.slane %v2373_v5, %v4361_v48 }
  0x73   : > { %v2424_v32 = vrot.slane %v2402_v23, %v4320_v14  ;;  %v2403_v34 = vcombine.high %v2401_v25, %v2401_v25  ;;  %v4359_v44 = vrot.slane %v2401_v25, %v4320_v14  ;;  %v2482_v23 = vcombine.high %v2473_v6, %v2473_v6 }
  0x74   : > { %3890 = vmatmul.mubr.f32.vlgmr.msra.gmra.mrb[2].mxu0 %v4262_v54  ;;  %v2748_v54 = vcombine.high %v2740_v38, %v2740_v38  ;;  %v4431_v25 = vrot.slane %v2732_v10, %v4361_v48  ;;  %v4437_v29 = vrot.slane %v2473_v6, %v4361_v48  ;;  %v2432_v36 = vcombine.high %v4351_v39, %v4351_v39 }
  0x75   : > { %3932 = vmatmul.mubr.f32.vlgmr.msra.gmra.mrb[2].mxu1 %v4264_v55  ;;  %v2434_v47 = vcombine.high %v2424_v32, %v2424_v32  ;;  %v2431_v50 = vrot.slane %v2403_v34, %v4320_v14  ;;  %v2731_v55 = vcombine.high %v2721_v41, %v2721_v41  ;;  %v4388_v0 = vrot.slane %v2424_v32, %v4361_v48 }
  0x76   : > { %v2770_v7 = vrot.slane %v2748_v54, %v4320_v14  ;;  %v2777_v32 = vrot.slane %v2749_v4, %v4320_v14  ;;  %v2911_v34 = vcombine.high %v3639_v20, %v3639_v20  ;;  %v4455_v38 = vrot.slane %v2482_v23, %v4361_v48  ;;  %v4536_v23 = vld [vmem:[%s5155_s1 + $0x28] sm:$0x3f] }
  0x77   : > { %v4385_v63 = vrot.slane %v2434_v47, %v4361_v48  ;;  %v2435_v2 = vcombine.high %v2431_v50, %v2431_v50  ;;  %v4397_v8 = vrot.slane %v2731_v55, %v4361_v48  ;;  %v4400_v9 = vrot.slane %v2431_v50, %v4361_v48  ;;  %5187 = vst [vmem:[#allocation8_spill] sm:$0xff] %v4536_v23 }
  0x78   : > { %v2779_v24 = vcombine.high %v2770_v7, %v2770_v7  ;;  %v4448_v35 = vrot.slane %v2770_v7, %v4361_v48  ;;  %v4458_v41 = vrot.slane %v2382_v22, %v4361_v48  ;;  %v4470_v47 = vrot.slane %v2480_v28, %v4361_v48 }
  0x79   : > { %v4421_v18 = vrot.slane %v2435_v2, %v4361_v48  ;;  %v4475_v50 = vrot.slane %v3639_v20, %v4320_v14  ;;  %v4478_v53 = vrot.slane %v2380_v31, %v4361_v48  ;;  %v4481_v54 = vrot.slane %v2777_v32, %v4361_v48 }
  0x7a   : > { %v4461_v42 = vrot.slane %v2779_v24, %v4361_v48  ;;  %v4484_v55 = vrot.slane %v3641_v33, %v4320_v14  ;;  %v4487_v57 = vrot.slane %v2911_v34, %v4320_v14  ;;  %v4490_v58 = vrot.slane %v2432_v36, %v4361_v48 }
  0x7b   : > { %5183 = vst [vmem:[#allocation4_spill] sm:$0xff] %v4475_v50  ;;  %v4493_v59 = vrot.slane %v2729_v37, %v4361_v48  ;;  %v2433_v1 = vcombine.high %v4359_v44, %v4359_v44  ;;  %v2730_v2 = vcombine.high %v4376_v60, %v4376_v60  ;;  %v4506_v5 = vrot.slane %v4351_v39, %v4361_v48 }
  0x7c   : > { %5184 = vst [vmem:[#allocation5_spill] sm:$0xff] %v4484_v55  ;;  %5185 = vst [vmem:[#allocation6_spill] sm:$0xff] %v4487_v57  ;;  %v4510_v6 = vrot.slane %v4354_v40, %v4361_v48  ;;  %v4514_v7 = vrot.slane %v4359_v44, %v4361_v48  ;;  %v2481_v10 = vcombine.high %v2459_v26, %v2459_v26 }
  0x7d   : > { %v2926_v11 = vcombine.high %v4475_v50, %v4475_v50  ;;  %v4519_v15 = vrot.slane %v3138_v52, %v4320_v14  ;;  %v2381_v4 = vcombine.high %v2359_v21, %v2359_v21  ;;  %v2778_v20 = vcombine.high %v2756_v27, %v2756_v27 }
  0x7e   : > { %v3153_v39 = vcombine.high %v4484_v55, %v4484_v55  ;;  %v2927_v40 = vcombine.high %v4487_v57, %v4487_v57  ;;  %v4527_v22 = vrot.slane %v4366_v51, %v4361_v48  ;;  %v4531_v44 = vrot.slane %v4376_v60, %v4361_v48  ;;  %v4554_v60 = vld [vmem:[%s5155_s1 + $0x38] sm:$0x3f] }
  0x7f   : > { %5186 = vst [vmem:[#allocation7_spill] sm:$0xff] %v4519_v15  ;;  %v4540_v24 = vrot.slane %v4369_v56, %v4361_v48  ;;  %v4543_v28 = vrot.slane %v2433_v1, %v4361_v48  ;;  %v4546_v31 = vrot.slane %v2333_v62, %v4361_v48  ;;  %v4549_v51 = vrot.slane %v2730_v2, %v4361_v48 }
  0x80   : > { %5188 = vst [vmem:[#allocation9_spill] sm:$0xff] %v4554_v60  ;;  %v4557_v32 = vrot.slane %v2459_v26, %v4361_v48  ;;  %v4560_v56 = vrot.slane %v2359_v21, %v4361_v48  ;;  %v4563_v33 = vrot.slane %v2756_v27, %v4361_v48  ;;  %v4566_v34 = vrot.slane %v2481_v10, %v4361_v48 }
  0x81   : > { %v4569_v36 = vrot.slane %v2926_v11, %v4320_v14  ;;  %v4574_v43 = vrot.slane %v2381_v4, %v4361_v48  ;;  %v4577_v26 = vrot.slane %v2778_v20, %v4361_v48  ;;  %v4580_v21 = vrot.slane %v3153_v39, %v4320_v14 }
  0x82   : > { %v4583_v27 = vrot.slane %v2927_v40, %v4320_v14  ;;  %v4587_v52 = vrot.slane %v4536_v23, %v4320_v14  ;;  %v4590_v62 = vrot.slane %v2466_v46, %v4361_v48  ;;  %v4598_v10 = vrot.slane %v4554_v60, %v4320_v14 }
  0x83   : > { %5189 = vst [vmem:[#allocation10_spill] sm:$0xff] %v4569_v36  ;;  %5190 = vst [vmem:[#allocation11_spill] sm:$0xff] %v4580_v21  ;;  %v4603_v4 = vrot.slane %v2366_v45, %v4361_v48  ;;  %v4606_v20 = vrot.slane %v2763_v49, %v4361_v48 }
  0x84   : > { %5191 = vst [vmem:[#allocation12_spill] sm:$0xff] %v4583_v27 }
  0x85   : > { %5192 = vst [vmem:[#allocation13_spill] sm:$0xff] %v4606_v20 }
 0x11b   : > { %v4592_v1 = vpop.f32.mrb[0].mxu0 }
 0x11c   : > { %v4594_v2 = vpop.f32.mrb[0].mxu1  ;;  %v4608_v39 = vpop.f32.mrb[1].mxu0  ;;  %v2560_v40 = vmul.f32 %v4592_v1, %v4385_v63  ;;  %v2556_v27 = vmul.f32 %v4592_v1, %v4388_v0  ;;  %v2564_v11 = vmul.f32 %v4592_v1, %v4400_v9  ;;  %v2568_v45 = vmul.f32 %v4592_v1, %v4421_v18 }
 0x11d   : > { %v4610_v46 = vpop.f32.mrb[1].mxu1  ;;  %v2857_v37 = vmul.f32 %v4594_v2, %v4397_v8  ;;  %v2853_v49 = vmul.f32 %v4594_v2, %v4391_v3  ;;  %v2861_v48 = vmul.f32 %v4594_v2, %v4418_v17  ;;  %v2555_v57 = vmul.f32 %v4388_v0, %v4608_v39 }
 0x11e   : > { %v2658_v55 = vadd.f32 %v4405_v12, %v2560_v40  ;;  %v2654_v50 = vadd.f32 %v4408_v13, %v2556_v27  ;;  %v2852_v21 = vmul.f32 %v4391_v3, %v4610_v46  ;;  %v2662_v36 = vadd.f32 %v4415_v16, %v2564_v11 }
 0x11f   : > { %v2653_v60 = vadd.f32 %v4408_v13, %v2555_v57  ;;  %v2865_v23 = vmul.f32 %v4594_v2, %v4431_v25  ;;  %v2563_v0 = vmul.f32 %v4400_v9, %v4608_v39  ;;  %v2666_v27 = vadd.f32 %v4424_v19, %v2568_v45 }
 0x120   : > { %v4640_v15 = vadd.f32 %v2857_v37, %v2658_v55  ;;  %v4642_v40 = vadd.f32 %v2853_v49, %v2654_v50  ;;  %v2572_v3 = vmul.f32 %v4592_v1, %v4437_v29  ;;  %v4647_v14 = vadd.f32 %v2861_v48, %v2662_v36 }
 0x121   : > { %v4649_v11 = vadd.f32 %v2852_v21, %v2653_v60  ;;  %v2661_v13 = vadd.f32 %v4415_v16, %v2563_v0  ;;  %v2860_v57 = vmul.f32 %v4418_v17, %v4610_v46  ;;  %v4654_v20 = vadd.f32 %v2865_v23, %v2666_v27 }
 0x122   : > { %v2670_v9 = vadd.f32 %v4440_v30, %v2572_v3  ;;  %v2869_v50 = vmul.f32 %v4594_v2, %v4448_v35  ;;  %v2567_v55 = vmul.f32 %v4421_v18, %v4608_v39  ;;  %v2864_v48 = vmul.f32 %v4431_v25, %v4610_v46 }
 0x123   : > { %v4661_v37 = vadd.f32 %v2860_v57, %v2661_v13  ;;  %v2576_v16 = vmul.f32 %v4592_v1, %v4455_v38  ;;  %v2571_v17 = vmul.f32 %v4437_v29, %v4608_v39  ;;  %v2873_v36 = vmul.f32 %v4594_v2, %v4461_v42 }
 0x124   : > { %v4669_v23 = vadd.f32 %v2869_v50, %v2670_v9  ;;  %v2665_v60 = vadd.f32 %v4424_v19, %v2567_v55  ;;  %v2559_v18 = vmul.f32 %v4385_v63, %v4608_v39  ;;  %v2868_v45 = vmul.f32 %v4448_v35, %v4610_v46 }
 0x125   : > { %v2674_v21 = vadd.f32 %v4458_v41, %v2576_v16  ;;  %v2669_v25 = vadd.f32 %v4440_v30, %v2571_v17  ;;  %v2575_v29 = vmul.f32 %v4455_v38, %v4608_v39  ;;  %v2856_v0 = vmul.f32 %v4397_v8, %v4610_v46 }
 0x126   : > { %v4682_v49 = vadd.f32 %v2864_v48, %v2665_v60  ;;  %v2657_v19 = vadd.f32 %v4405_v12, %v2559_v18  ;;  %v2580_v63 = vmul.f32 %v4592_v1, %v4470_v47  ;;  %v2872_v35 = vmul.f32 %v4461_v42, %v4610_v46 }
 0x127   : > { %v4689_v27 = vadd.f32 %v2873_v36, %v2674_v21  ;;  %v4691_v3 = vadd.f32 %v2868_v45, %v2669_v25  ;;  %v2673_v30 = vadd.f32 %v4458_v41, %v2575_v29  ;;  %v2877_v12 = vmul.f32 %v4594_v2, %v4481_v54 }
 0x128   : > { %v4696_v38 = vadd.f32 %v2856_v0, %v2657_v19  ;;  %v2678_v13 = vadd.f32 %v4478_v53, %v2580_v63  ;;  %v2579_v8 = vmul.f32 %v4470_v47, %v4608_v39  ;;  %v2876_v9 = vmul.f32 %v4481_v54, %v4610_v46 }
 0x129   : > { %v4703_v57 = vadd.f32 %v2872_v35, %v2673_v30  ;;  %v2558_v41 = vmul.f32 %v4592_v1, %v4490_v58  ;;  %v2554_v42 = vmul.f32 %v4592_v1, %v4506_v5  ;;  %v2855_v48 = vmul.f32 %v4594_v2, %v4493_v59 }
 0x12a   : > { %v4711_v50 = vadd.f32 %v2877_v12, %v2678_v13  ;;  %v2677_v55 = vadd.f32 %v4478_v53, %v2579_v8  ;;  %v2562_v47 = vmul.f32 %v4592_v1, %v4514_v7  ;;  %v2851_v17 = vmul.f32 %v4594_v2, %v4510_v6 }
 0x12b   : > { %v2656_v16 = vadd.f32 %v4496_v61, %v2558_v41  ;;  %v2652_v54 = vadd.f32 %v4527_v22, %v2554_v42  ;;  %v2553_v60 = vmul.f32 %v4506_v5, %v4608_v39  ;;  %v2859_v18 = vmul.f32 %v4594_v2, %v4531_v44 }
 0x12c   : > { %v4724_v36 = vadd.f32 %v2876_v9, %v2677_v55  ;;  %v2660_v53 = vadd.f32 %v4540_v24, %v2562_v47  ;;  %v2566_v21 = vmul.f32 %v4592_v1, %v4543_v28  ;;  %v2850_v19 = vmul.f32 %v4510_v6, %v4610_v46 }
 0x12d   : > { %v4731_v25 = vadd.f32 %v2855_v48, %v2656_v16  ;;  %v4733_v45 = vadd.f32 %v2851_v17, %v2652_v54  ;;  %v2651_v29 = vadd.f32 %v4527_v22, %v2553_v60  ;;  %v2863_v63 = vmul.f32 %v4594_v2, %v4549_v51 }
 0x12e   : > { %v4738_v5 = vadd.f32 %v2859_v18, %v2660_v53  ;;  %v2664_v0 = vadd.f32 %v4546_v31, %v2566_v21  ;;  %v2561_v30 = vmul.f32 %v4514_v7, %v4608_v39  ;;  %v2858_v13 = vmul.f32 %v4531_v44, %v4610_v46 }
 0x12f   : > { %v4745_v35 = vadd.f32 %v2850_v19, %v2651_v29  ;;  %v2570_v22 = vmul.f32 %v4592_v1, %v4557_v32  ;;  %v2565_v6 = vmul.f32 %v4543_v28, %v4608_v39  ;;  %v2867_v9 = vmul.f32 %v4594_v2, %v4563_v33  ;;  %v5198_v19 = vld [vmem:[#allocation13_spill] sm:$0xff] }
 0x130   : > { %v4753_v12 = vadd.f32 %v2863_v63, %v2664_v0  ;;  %v2659_v8 = vadd.f32 %v4540_v24, %v2561_v30  ;;  %v2574_v7 = vmul.f32 %v4592_v1, %v4566_v34  ;;  %v2862_v42 = vmul.f32 %v4549_v51, %v4610_v46  ;;  %v5200_v63 = vld [vmem:[#allocation7_spill] sm:$0xff] }
 0x131   : > { %v2668_v41 = vadd.f32 %v4560_v56, %v2570_v22  ;;  %v2663_v44 = vadd.f32 %v4546_v31, %v2565_v6  ;;  %v2569_v28 = vmul.f32 %v4557_v32, %v4608_v39  ;;  %v2871_v48 = vmul.f32 %v4594_v2, %v4577_v26  ;;  %v5204_v6 = vld [vmem:[#allocation9_spill] sm:$0xff] }
 0x132   : > { %v4766_v55 = vadd.f32 %v2858_v13, %v2659_v8  ;;  %v2672_v24 = vadd.f32 %v4574_v43, %v2574_v7  ;;  %v2557_v47 = vmul.f32 %v4490_v58, %v4608_v39  ;;  %v2866_v51 = vmul.f32 %v4563_v33, %v4610_v46  ;;  %v5208_v7 = vld [vmem:[#allocation11_spill] sm:$0xff] }
 0x133   : > { %v4773_v16 = vadd.f32 %v2867_v9, %v2668_v41  ;;  %v4775_v54 = vadd.f32 %v2862_v42, %v2663_v44  ;;  %v2667_v31 = vadd.f32 %v4560_v56, %v2569_v28  ;;  %v2854_v60 = vmul.f32 %v4493_v59, %v4610_v46 }
 0x134   : > { %v4780_v32 = vadd.f32 %v2871_v48, %v2672_v24  ;;  %v2655_v17 = vadd.f32 %v4496_v61, %v2557_v47  ;;  %v2573_v53 = vmul.f32 %v4566_v34, %v4608_v39  ;;  %v2975_v58 = vcombine.high %v4587_v52, %v4587_v52  ;;  %v5211_v48 = vld [vmem:[#allocation4_spill] sm:$0xff] }
 0x135   : > { %5193 = vst [vmem:[#allocation14_spill] sm:$0xff] %v4773_v16  ;;  %5194 = vst [vmem:[#allocation15_spill] sm:$0xff] %v4775_v54  ;;  %v4789_v18 = vadd.f32 %v2866_v51, %v2667_v31  ;;  %v2578_v56 = vmul.f32 %v4592_v1, %v4590_v62  ;;  %v2577_v33 = vmul.f32 %v4590_v62, %v4608_v39  ;;  %v5199_v39 = vld [vmem:[#allocation2_spill] sm:$0xff]  ;;  %v5212_v31 = vld [vmem:[#allocation5_spill] sm:$0xff] }
 0x136   : > { %5195 = vst [vmem:[#allocation16_spill] sm:$0xff] %v4780_v32  ;;  %v3202_v61 = vcombine.high %v4598_v10, %v4598_v10  ;;  %v4797_v21 = vadd.f32 %v2854_v60, %v2655_v17  ;;  %v2671_v59 = vadd.f32 %v4574_v43, %v2573_v53  ;;  %v2870_v34 = vmul.f32 %v4577_v26, %v4610_v46  ;;  %v5202_v43 = vld [vmem:[#allocation8_spill] sm:$0xff]  ;;  %v5213_v17 = vld [vmem:[#allocation6_spill] sm:$0xff] }
 0x137   : > { %5196 = vst [vmem:[#allocation17_spill] sm:$0xff] %v4789_v18  ;;  %v2676_v29 = vadd.f32 %v4603_v4, %v2578_v56  ;;  %v2875_v0 = vmul.f32 %v4594_v2, %v5198_v19  ;;  %v2675_v1 = vadd.f32 %v4603_v4, %v2577_v33  ;;  %v2874_v62 = vmul.f32 %v5198_v19, %v4610_v46  ;;  %v5207_v4 = vld [vmem:[#allocation10_spill] sm:$0xff] }
 0x138   : > { %5197 = vst [vmem:[#allocation18_spill] sm:$0xff] %v4797_v21  ;;  %v5201_v30 = vcombine.high %v5200_v63, %v5200_v63  ;;  %v5203_v22 = vcombine.high %v5202_v43, %v5202_v43  ;;  %v5205_v8 = vcombine.high %v5204_v6, %v5204_v6  ;;  %v4820_v9 = vadd.f32 %v2870_v34, %v2671_v59  ;;  %v5214_v59 = vld [vmem:[#allocation3_spill] sm:$0xff] }
 0x139   : > { %v2958_v46 = vcombine.high %v5207_v4, %v5207_v4  ;;  %v3185_v41 = vcombine.high %v5208_v7, %v5208_v7  ;;  %v4826_v44 = vadd.f32 %v2875_v0, %v2676_v29  ;;  %v4828_v42 = vadd.f32 %v2874_v62, %v2675_v1 }
 0x13a   : > { %v3182_v13 = vrot.slane %v5201_v30, %v5199_v39  ;;  %v2974_v26 = vrot.slane %v5203_v22, %v5199_v39  ;;  %v3201_v2 = vrot.slane %v5205_v8, %v5199_v39  ;;  %5206 = vst [vmem:[#allocation13_spill] sm:$0xff] %v4820_v9  ;;  %v2997_v28 = vrot.slane %v2975_v58, %v5199_v39 }
 0x13b   : > { %5209 = vst [vmem:[#allocation2_spill] sm:$0xff] %v4826_v44  ;;  %5210 = vst [vmem:[#allocation7_spill] sm:$0xff] %v4828_v42  ;;  %v3224_v24 = vrot.slane %v3202_v61, %v5199_v39  ;;  %v2934_v47 = vrot.slane %v5211_v48, %v5199_v39  ;;  %v3161_v51 = vrot.slane %v5212_v31, %v5199_v39  ;;  %v5215_v61 = vld [vmem:[#allocation12_spill] sm:$0xff] }
 0x13c   : > { %v2941_v60 = vrot.slane %v5213_v17, %v5199_v39  ;;  %v3168_v53 = vrot.slane %v5200_v63, %v5199_v39  ;;  %v2976_v56 = vcombine.high %v2974_v26, %v2974_v26  ;;  %v3203_v33 = vcombine.high %v3201_v2, %v3201_v2 }
 0x13d   : > { %v4841_v34 = vrot.slane %v2958_v46, %v5214_v59  ;;  %v4844_v58 = vrot.slane %v3185_v41, %v5214_v59  ;;  %v2959_v29 = vcombine.high %v5215_v61, %v5215_v61  ;;  %v3186_v19 = vcombine.high %v3182_v13, %v3182_v13 }
 0x13e   : > { %v3014_v0 = vrot.slane %v5207_v4, %v5214_v59  ;;  %v3241_v1 = vrot.slane %v5208_v7, %v5214_v59  ;;  %v3006_v62 = vcombine.high %v2997_v28, %v2997_v28  ;;  %v3233_v63 = vcombine.high %v3224_v24, %v3224_v24 }
 0x13f   : > { %v3030_v30 = vrot.slane %v5215_v61, %v5214_v59  ;;  %v3257_v43 = vrot.slane %v3182_v13, %v5214_v59  ;;  %v2983_v22 = vrot.slane %v4587_v52, %v5199_v39  ;;  %v3210_v6 = vrot.slane %v4598_v10, %v5199_v39 }
 0x140   : > { %v3004_v8 = vrot.slane %v2976_v56, %v5199_v39  ;;  %v3231_v4 = vrot.slane %v3203_v33, %v5199_v39  ;;  %v2956_v46 = vcombine.high %v2934_v47, %v2934_v47  ;;  %v3183_v41 = vcombine.high %v3161_v51, %v3161_v51 }
 0x141   : > { %v4862_v7 = vrot.slane %v2959_v29, %v5214_v59  ;;  %v4865_v48 = vrot.slane %v3186_v19, %v5214_v59  ;;  %v4868_v13 = vrot.slane %v2997_v28, %v5214_v59  ;;  %v4871_v52 = vrot.slane %v3224_v24, %v5214_v59 }
 0x142   : > { %v4874_v10 = vrot.slane %v3006_v62, %v5214_v59  ;;  %v4877_v31 = vrot.slane %v3233_v63, %v5214_v59  ;;  %v2957_v17 = vcombine.high %v2941_v60, %v2941_v60  ;;  %v3184_v56 = vcombine.high %v3168_v53, %v3168_v53 }
 0x143   : > { %v2990_v33 = vrot.slane %v2974_v26, %v5199_v39  ;;  %v3217_v61 = vrot.slane %v3201_v2, %v5199_v39  ;;  %v3005_v29 = vcombine.high %v2983_v22, %v2983_v22  ;;  %v3232_v19 = vcombine.high %v3210_v6, %v3210_v6 }
 0x144   : > { %v4882_v28 = vrot.slane %v3004_v8, %v5214_v59  ;;  %v4885_v24 = vrot.slane %v3231_v4, %v5214_v59  ;;  %v4888_v62 = vrot.slane %v2956_v46, %v5214_v59  ;;  %v4891_v63 = vrot.slane %v3183_v41, %v5214_v59 }
 0x145   : > { %v4894_v42 = vrot.slane %v2934_v47, %v5214_v59  ;;  %v4897_v26 = vrot.slane %v3161_v51, %v5214_v59  ;;  %v4900_v39 = vrot.slane %v2941_v60, %v5214_v59  ;;  %v4903_v2 = vrot.slane %v3168_v53, %v5214_v59 }
 0x146   : > { %v4906_v8 = vrot.slane %v2957_v17, %v5214_v59  ;;  %v4909_v4 = vrot.slane %v3184_v56, %v5214_v59  ;;  %v4912_v46 = vrot.slane %v2983_v22, %v5214_v59  ;;  %v4915_v47 = vrot.slane %v3210_v6, %v5214_v59 }
 0x147   : > { %v4917_v51 = vpop.f32.mrb[2].mxu0  ;;  %v4922_v60 = vrot.slane %v3005_v29, %v5214_v59  ;;  %v4925_v53 = vrot.slane %v3232_v19, %v5214_v59  ;;  %v4928_v17 = vrot.slane %v2990_v33, %v5214_v59  ;;  %v4931_v56 = vrot.slane %v3217_v61, %v5214_v59 }
 0x148   : > { %5216 = vst [vmem:[#allocation8_spill] sm:$0xff] %v4915_v47  ;;  %v4919_v41 = vpop.f32.mrb[2].mxu1  ;;  %v4933_v22 = vpop.f32.mrb[3].mxu0  ;;  %v3084_v44 = vmul.f32 %v4917_v51, %v4841_v34  ;;  %v3080_v9 = vmul.f32 %v4917_v51, %v3014_v0  ;;  %v3088_v33 = vmul.f32 %v4917_v51, %v3030_v30  ;;  %v3092_v18 = vmul.f32 %v4917_v51, %v4862_v7 }
 0x149   : > { %5217 = vst [vmem:[#allocation9_spill] sm:$0xff] %v4922_v60  ;;  %5218 = vst [vmem:[#allocation10_spill] sm:$0xff] %v4925_v53  ;;  %v4935_v6 = vpop.f32.mrb[3].mxu1  ;;  %v3311_v29 = vmul.f32 %v4919_v41, %v4844_v58  ;;  %v3307_v19 = vmul.f32 %v4919_v41, %v3241_v1  ;;  %v3315_v21 = vmul.f32 %v4919_v41, %v3257_v43 }
 0x14a   : > { %5219 = vst [vmem:[#allocation11_spill] sm:$0xff] %v4928_v17  ;;  %5220 = vst [vmem:[#allocation4_spill] sm:$0xff] %v4931_v56  ;;  %v3079_v59 = vmul.f32 %v3014_v0, %v4933_v22  ;;  %v3306_v61 = vmul.f32 %v3241_v1, %v4935_v6  ;;  %v3112_v56 = vadd.f32 %v3084_v44, %v4640_v15 }
 0x14b   : > { %v3108_v17 = vadd.f32 %v3080_v9, %v4642_v40  ;;  %v3319_v32 = vmul.f32 %v4919_v41, %v4865_v48  ;;  %v3116_v53 = vadd.f32 %v3088_v33, %v4647_v14  ;;  %v3087_v54 = vmul.f32 %v3030_v30, %v4933_v22 }
 0x14c   : > { %v3107_v60 = vadd.f32 %v3079_v59, %v4649_v11  ;;  %v3314_v0 = vmul.f32 %v3257_v43, %v4935_v6  ;;  %v3339_v47 = vadd.f32 %v3311_v29, %v3112_v56  ;;  %v3120_v15 = vadd.f32 %v3092_v18, %v4654_v20 }
 0x14d   : > { %v3335_v1 = vadd.f32 %v3307_v19, %v3108_v17  ;;  %v3096_v40 = vmul.f32 %v4917_v51, %v4868_v13  ;;  %v3343_v9 = vadd.f32 %v3315_v21, %v3116_v53  ;;  %v3115_v16 = vadd.f32 %v3087_v54, %v4661_v37 }
 0x14e   : > { %v3334_v44 = vadd.f32 %v3306_v61, %v3107_v60  ;;  %v3323_v14 = vmul.f32 %v4919_v41, %v4871_v52  ;;  %vm3367_vm1 = vcmp.gt.f32.partialorder %v3339_v47, 0.0  ;;  %v3395_v11 = vmul.f32 -0.1, %v3339_v47 }
 0x14f   : > { %vm3363_vm2 = vcmp.gt.f32.partialorder %v3335_v1, 0.0  ;;  %v3391_v30 = vmul.f32 -0.1, %v3335_v1  ;;  %vm3371_vm3 = vcmp.gt.f32.partialorder %v3343_v9, 0.0  ;;  %v3399_v43 = vmul.f32 -0.1, %v3343_v9 }
 0x150   : > { %vm3362_vm4 = vcmp.gt.f32.partialorder %v3334_v44, 0.0  ;;  %v3390_v17 = vmul.f32 -0.1, %v3334_v44  ;;  %v3423_v56 = vsel %vm3367_vm1, %v3339_v47, %v3395_v11  ;;  %v3347_v18 = vadd.f32 %v3319_v32, %v3120_v15 }
 0x151   : > { %v3419_v20 = vsel %vm3363_vm2, %v3335_v1, %v3391_v30  ;;  %v3342_v29 = vadd.f32 %v3314_v0, %v3115_v16  ;;  %3465 = vrot.lane.b32.xlu1 %v3423_v56, %s4132_s25  ;;  %v3427_v37 = vsel %vm3371_vm3, %v3343_v9, %v3399_v43  ;;  %v3124_v21 = vadd.f32 %v3096_v40, %v4669_v23 }
 0x152   : > { %3451 = vrot.lane.b32.xlu0 %v3419_v20, %s4132_s25  ;;  %v3418_v54 = vsel %vm3362_vm4, %v3334_v44, %v3390_v17  ;;  %vm3375_vm5 = vcmp.gt.f32.partialorder %v3347_v18, 0.0  ;;  %v3403_v60 = vmul.f32 -0.1, %v3347_v18  ;;  %v3091_v47 = vmul.f32 %v4862_v7, %v4933_v22 }
 0x153   : > { %vm3370_vm6 = vcmp.gt.f32.partialorder %v3342_v29, 0.0  ;;  %v3398_v53 = vmul.f32 -0.1, %v3342_v29  ;;  %v3351_v19 = vadd.f32 %v3323_v14, %v3124_v21  ;;  %v3318_v16 = vmul.f32 %v4865_v48, %v4935_v6 }
 0x154   : > { %v3100_v32 = vmul.f32 %v4917_v51, %v4874_v10  ;;  %v3431_v33 = vsel %vm3375_vm5, %v3347_v18, %v3403_v60  ;;  %v3327_v61 = vmul.f32 %v4919_v41, %v4877_v31  ;;  %v3095_v23 = vmul.f32 %v4868_v13, %v4933_v22 }
 0x155   : > { %v3426_v59 = vsel %vm3370_vm6, %v3342_v29, %v3398_v53  ;;  %3478 = vrot.lane.b32.xlu1 %v3427_v37, %s4132_s25  ;;  %vm3379_vm7 = vcmp.gt.f32.partialorder %v3351_v19, 0.0  ;;  %v3407_v7 = vmul.f32 -0.1, %v3351_v19  ;;  %v3119_v0 = vadd.f32 %v3091_v47, %v4682_v49 }
 0x156   : > { %3449 = vrot.lane.b32.xlu0 %v3418_v54, %s4132_s25  ;;  %v3128_v48 = vadd.f32 %v3100_v32, %v4689_v27  ;;  %v3123_v1 = vadd.f32 %v3095_v23, %v4691_v3  ;;  %v3322_v15 = vmul.f32 %v4871_v52, %v4935_v6  ;;  %v3083_v40 = vmul.f32 %v4841_v34, %v4933_v22 }
 0x157   : > { %v3310_v13 = vmul.f32 %v4844_v58, %v4935_v6  ;;  %v3435_v9 = vsel %vm3379_vm7, %v3351_v19, %v3407_v7  ;;  %v3346_v44 = vadd.f32 %v3318_v16, %v3119_v0  ;;  %v3099_v11 = vmul.f32 %v4874_v10, %v4933_v22 }
 0x158   : > { %v3355_v14 = vadd.f32 %v3327_v61, %v3128_v48  ;;  %v3350_v49 = vadd.f32 %v3322_v15, %v3123_v1  ;;  %v3111_v27 = vadd.f32 %v3083_v40, %v4696_v38  ;;  %v3326_v3 = vmul.f32 %v4877_v31, %v4935_v6 }
 0x159   : > { %v3104_v52 = vmul.f32 %v4917_v51, %v4882_v28  ;;  %3491 = vrot.lane.b32.xlu1 %v3431_v33, %s4132_s25  ;;  %vm3374_vm8 = vcmp.gt.f32.partialorder %v3346_v44, 0.0  ;;  %v3402_v34 = vmul.f32 -0.1, %v3346_v44  ;;  %v3127_v43 = vadd.f32 %v3099_v11, %v4703_v57 }
 0x15a   : > { %3476 = vrot.lane.b32.xlu0 %v3426_v59, %s4132_s25  ;;  %vm3383_vm9 = vcmp.gt.f32.partialorder %v3355_v14, 0.0  ;;  %v3411_v58 = vmul.f32 -0.1, %v3355_v14  ;;  %vm3378_vm10 = vcmp.gt.f32.partialorder %v3350_v49, 0.0  ;;  %v3406_v30 = vmul.f32 -0.1, %v3350_v49 }
 0x15b   : > { %v3338_v10 = vadd.f32 %v3310_v13, %v3111_v27  ;;  %v3430_v38 = vsel %vm3374_vm8, %v3346_v44, %v3402_v34  ;;  %v3132_v31 = vadd.f32 %v3104_v52, %v4711_v50  ;;  %v3331_v56 = vmul.f32 %v4919_v41, %v4885_v24 }
 0x15c   : > { %v3439_v17 = vsel %vm3383_vm9, %v3355_v14, %v3411_v58  ;;  %v3434_v20 = vsel %vm3378_vm10, %v3350_v49, %v3406_v30  ;;  %v3354_v29 = vadd.f32 %v3326_v3, %v3127_v43  ;;  %v3103_v57 = vmul.f32 %v4882_v28, %v4933_v22  ;;  %v5221_v30 = vld [vmem:[#allocation14_spill] sm:$0xff] }
 0x15d   : > { %vm3366_vm11 = vcmp.gt.f32.partialorder %v3338_v10, 0.0  ;;  %v3394_v18 = vmul.f32 -0.1, %v3338_v10  ;;  %3504 = vrot.lane.b32.xlu1 %v3435_v9, %s4132_s25  ;;  %v3359_v37 = vadd.f32 %v3331_v56, %v3132_v31  ;;  %v3330_v54 = vmul.f32 %v4885_v24, %v4935_v6 }
 0x15e   : > { %3489 = vrot.lane.b32.xlu0 %v3430_v38, %s4132_s25  ;;  %vm3382_vm12 = vcmp.gt.f32.partialorder %v3354_v29, 0.0  ;;  %v3410_v21 = vmul.f32 -0.1, %v3354_v29  ;;  %v3309_v60 = vmul.f32 %v4919_v41, %v4891_v63  ;;  %v3131_v19 = vadd.f32 %v3103_v57, %v4724_v36 }
 0x15f   : > { %v3422_v50 = vsel %vm3366_vm11, %v3338_v10, %v3394_v18  ;;  %vm3387_vm13 = vcmp.gt.f32.partialorder %v3359_v37, 0.0  ;;  %v3415_v53 = vmul.f32 -0.1, %v3359_v37  ;;  %v3082_v47 = vmul.f32 %v4917_v51, %v4888_v62 }
 0x160   : > { %v3438_v16 = vsel %vm3382_vm12, %v3354_v29, %v3410_v21  ;;  %v3305_v28 = vmul.f32 %v4919_v41, %v4897_v26  ;;  %v3078_v24 = vmul.f32 %v4917_v51, %v4894_v42  ;;  %v3086_v32 = vmul.f32 %v4917_v51, %v4900_v39 }
 0x161   : > { %3517 = vrot.lane.b32.xlu1 %v3439_v17, %s4132_s25  ;;  %v3443_v33 = vsel %vm3387_vm13, %v3359_v37, %v3415_v53  ;;  %v3358_v36 = vadd.f32 %v3330_v54, %v3131_v19  ;;  %v3110_v59 = vadd.f32 %v3082_v47, %v4731_v25  ;;  %v3313_v7 = vmul.f32 %v4919_v41, %v4903_v2  ;;  %v5224_v37 = vld [vmem:[#allocation9_spill] sm:$0xff]  ;;  %v5225_v54 = vld [vmem:[#allocation10_spill] sm:$0xff]  ;;  %v5226_v19 = vld [vmem:[#allocation16_spill] sm:$0xff] }
 0x162   : > { %3502 = vrot.lane.b32.xlu0 %v3434_v20, %s4132_s25  ;;  %v3106_v61 = vadd.f32 %v3078_v24, %v4733_v45  ;;  %v3114_v23 = vadd.f32 %v3086_v32, %v4738_v5  ;;  %v3304_v0 = vmul.f32 %v4897_v26, %v4935_v6  ;;  %v3077_v15 = vmul.f32 %v4894_v42, %v4933_v22 }
 0x163   : > { %vm3386_vm15 = vcmp.gt.f32.partialorder %v3358_v36, 0.0  ;;  %v3414_v48 = vmul.f32 -0.1, %v3358_v36  ;;  %v3337_v1 = vadd.f32 %v3309_v60, %v3110_v59  ;;  %v3090_v25 = vmul.f32 %v4917_v51, %v4906_v8 }
 0x164   : > { %v3333_v40 = vadd.f32 %v3305_v28, %v3106_v61  ;;  %v3341_v13 = vadd.f32 %v3313_v7, %v3114_v23  ;;  %v3317_v45 = vmul.f32 %v4919_v41, %v4909_v4  ;;  %v3105_v26 = vadd.f32 %v3077_v15, %v4745_v35  ;;  %v5227_v28 = vld [vmem:[#allocation17_spill] sm:$0xff] }
 0x165   : > { %3463 = vrot.lane.b32.xlu1 %v3422_v50, %s4132_s25  ;;  %v3442_v5 = vsel %vm3386_vm15, %v3358_v36, %v3414_v48  ;;  %vm3365_vm0 = vcmp.gt.f32.partialorder %v3337_v1, 0.0  ;;  %v3393_v42 = vmul.f32 -0.1, %v3337_v1  ;;  %v3118_v49 = vadd.f32 %v3090_v25, %v4753_v12  ;;  %v5230_v25 = vld [vmem:[#allocation13_spill] sm:$0xff] }
 0x166   : > { %3515 = vrot.lane.b32.xlu0 %v3438_v16, %s4132_s25  ;;  %vm3361_vm1 = vcmp.gt.f32.partialorder %v3333_v40, 0.0  ;;  %v3389_v9 = vmul.f32 -0.1, %v3333_v40  ;;  %vm3369_vm2 = vcmp.gt.f32.partialorder %v3341_v13, 0.0  ;;  %v3397_v44 = vmul.f32 -0.1, %v3341_v13 }
 0x167   : > { %v3421_v14 = vsel %vm3365_vm0, %v3337_v1, %v3393_v42  ;;  %v3332_v11 = vadd.f32 %v3304_v0, %v3105_v26  ;;  %v3085_v27 = vmul.f32 %v4900_v39, %v4933_v22  ;;  %v3312_v35 = vmul.f32 %v4903_v2, %v4935_v6  ;;  %v5222_v2 = vld [vmem:[#allocation8_spill] sm:$0xff]  ;;  %v5228_v1 = vld [vmem:[#allocation11_spill] sm:$0xff]  ;;  %v5231_v42 = vld [vmem:[#allocation2_spill] sm:$0xff] }
 0x168   : > { %3644 = vst.msk [vmem:[%s5036_s28 + $0x18] sm:$0xff] %vm3444_vm14, %v3421_v14  ;;  %v3417_v3 = vsel %vm3361_vm1, %v3333_v40, %v3389_v9  ;;  %v3425_v52 = vsel %vm3369_vm2, %v3341_v13, %v3397_v44  ;;  %v3094_v34 = vmul.f32 %v4917_v51, %v4912_v46  ;;  %v3345_v39 = vadd.f32 %v3317_v45, %v3118_v49  ;;  %v5229_v13 = vld [vmem:[#allocation18_spill] sm:$0xff]  ;;  %v5232_v9 = vld [vmem:[#allocation4_spill] sm:$0xff] }
 0x169   : > { %3530 = vrot.lane.b32.xlu1 %v3443_v33, %s4132_s25  ;;  %3446 = vst.msk [vmem:[%s5036_s28 + $0x8] sm:$0xff] %vm3444_vm14, %v3417_v3  ;;  %3648 = vst.msk [vmem:[%s5036_s28 + $0x28] sm:$0xff] %vm3444_vm14, %v3425_v52  ;;  %vm3360_vm3 = vcmp.gt.f32.partialorder %v3332_v11, 0.0  ;;  %v3388_v12 = vmul.f32 -0.1, %v3332_v11  ;;  %v3113_v58 = vadd.f32 %v3085_v27, %v4766_v55  ;;  %v3321_v43 = vmul.f32 %v4919_v41, %v5222_v2  ;;  %v5223_v55 = vld [vmem:[#allocation15_spill] sm:$0xff] }
 0x16a   : > { %3528 = vrot.lane.b32.xlu0 %v3442_v5, %s4132_s25  ;;  %v3122_v10 = vadd.f32 %v3094_v34, %v5221_v30  ;;  %v3089_v38 = vmul.f32 %v4906_v8, %v4933_v22  ;;  %v3316_v17 = vmul.f32 %v4909_v4, %v4935_v6  ;;  %vm3373_vm4 = vcmp.gt.f32.partialorder %v3345_v39, 0.0  ;;  %v5233_v3 = vld [vmem:[#allocation7_spill] sm:$0xff] }
 0x16b   : > { %v3416_v31 = vsel %vm3360_vm3, %v3332_v11, %v3388_v12  ;;  %v3401_v56 = vmul.f32 -0.1, %v3345_v39  ;;  %v3340_v20 = vadd.f32 %v3312_v35, %v3113_v58  ;;  %v3098_v57 = vmul.f32 %v4917_v51, %v5224_v37 }
 0x16c   : > { %3445 = vst.msk [vmem:[%s5036_s28] sm:$0xff] %vm3444_vm14, %v3416_v31  ;;  %v3349_v18 = vadd.f32 %v3321_v43, %v3122_v10  ;;  %v3117_v29 = vadd.f32 %v3089_v38, %v5223_v55  ;;  %v3325_v50 = vmul.f32 %v4919_v41, %v5225_v54  ;;  %v3093_v4 = vmul.f32 %v4912_v46, %v4933_v22 }
 0x16d   : > { %v3429_v8 = vsel %vm3373_vm4, %v3345_v39, %v3401_v56  ;;  %vm3368_vm5 = vcmp.gt.f32.partialorder %v3340_v20, 0.0  ;;  %v3396_v21 = vmul.f32 -0.1, %v3340_v20  ;;  %v3126_v47 = vadd.f32 %v3098_v57, %v5226_v19 }
 0x16e   : > { %3652 = vst.msk [vmem:[%s5036_s28 + $0x38] sm:$0xff] %vm3444_vm14, %v3429_v8  ;;  %vm3377_vm6 = vcmp.gt.f32.partialorder %v3349_v18, 0.0  ;;  %v3405_v60 = vmul.f32 -0.1, %v3349_v18  ;;  %v3344_v53 = vadd.f32 %v3316_v17, %v3117_v29  ;;  %v3121_v24 = vadd.f32 %v3093_v4, %v5227_v28 }
 0x16f   : > { %v3424_v16 = vsel %vm3368_vm5, %v3340_v20, %v3396_v21  ;;  %v3320_v32 = vmul.f32 %v5222_v2, %v4935_v6  ;;  %v3308_v33 = vmul.f32 %v4891_v63, %v4935_v6  ;;  %v3353_v59 = vadd.f32 %v3325_v50, %v3126_v47 }
 0x170   : > { %3647 = vst.msk [vmem:[%s5036_s28 + $0x20] sm:$0xff] %vm3444_vm14, %v3424_v16  ;;  %v3433_v46 = vsel %vm3377_vm6, %v3349_v18, %v3405_v60  ;;  %vm3372_vm7 = vcmp.gt.f32.partialorder %v3344_v53, 0.0  ;;  %v3400_v36 = vmul.f32 -0.1, %v3344_v53  ;;  %v3081_v23 = vmul.f32 %v4888_v62, %v4933_v22 }
 0x171   : > { %3656 = vst.msk [vmem:[%s5036_s28 + $0x48] sm:$0xff] %vm3444_vm14, %v3433_v46  ;;  %v3348_v61 = vadd.f32 %v3320_v32, %v3121_v24  ;;  %v3097_v7 = vmul.f32 %v5224_v37, %v4933_v22  ;;  %v3324_v0 = vmul.f32 %v5225_v54, %v4935_v6  ;;  %vm3381_vm8 = vcmp.gt.f32.partialorder %v3353_v59, 0.0 }
 0x172   : > { %v3428_v63 = vsel %vm3372_vm7, %v3344_v53, %v3400_v36  ;;  %v3409_v48 = vmul.f32 -0.1, %v3353_v59  ;;  %v3102_v15 = vmul.f32 %v4917_v51, %v5228_v1  ;;  %v3109_v62 = vadd.f32 %v3081_v23, %v5229_v13 }
 0x173   : > { %3651 = vst.msk [vmem:[%s5036_s28 + $0x30] sm:$0xff] %vm3444_vm14, %v3428_v63  ;;  %vm3376_vm9 = vcmp.gt.f32.partialorder %v3348_v61, 0.0  ;;  %v3404_v40 = vmul.f32 -0.1, %v3348_v61  ;;  %v3125_v45 = vadd.f32 %v3097_v7, %v5230_v25  ;;  %v3329_v44 = vmul.f32 %v4919_v41, %v5232_v9 }
 0x174   : > { %v3437_v5 = vsel %vm3381_vm8, %v3353_v59, %v3409_v48  ;;  %v3130_v26 = vadd.f32 %v3102_v15, %v5231_v42  ;;  %v3101_v14 = vmul.f32 %v5228_v1, %v4933_v22  ;;  %v3336_v11 = vadd.f32 %v3308_v33, %v3109_v62 }
 0x175   : > { %3660 = vst.msk [vmem:[%s5036_s28 + $0x58] sm:$0xff] %vm3444_vm14, %v3437_v5  ;;  %v3432_v51 = vsel %vm3376_vm9, %v3348_v61, %v3404_v40  ;;  %v3352_v49 = vadd.f32 %v3324_v0, %v3125_v45  ;;  %v3328_v35 = vmul.f32 %v5232_v9, %v4935_v6  ;;  %vm3455_vm15 = vcmask 523520  }
 0x176   : > { %3655 = vst.msk [vmem:[%s5036_s28 + $0x40] sm:$0xff] %vm3444_vm14, %v3432_v51  ;;  %v3357_v27 = vadd.f32 %v3329_v44, %v3130_v26  ;;  %v3129_v52 = vadd.f32 %v3101_v14, %v5233_v3  ;;  %vm3364_vm10 = vcmp.gt.f32.partialorder %v3336_v11, 0.0  ;;  %v3392_v41 = vmul.f32 -0.1, %v3336_v11 }
 0x177   : > { %vm3380_vm11 = vcmp.gt.f32.partialorder %v3352_v49, 0.0  ;;  %v3408_v22 = vmul.f32 -0.1, %v3352_v49 }
 0x178   : > { %vm3385_vm12 = vcmp.gt.f32.partialorder %v3357_v27, 0.0  ;;  %v3413_v34 = vmul.f32 -0.1, %v3357_v27  ;;  %v3356_v12 = vadd.f32 %v3328_v35, %v3129_v52  ;;  %v3420_v39 = vsel %vm3364_vm10, %v3336_v11, %v3392_v41 }
 0x179   : > { %v3436_v58 = vsel %vm3380_vm11, %v3352_v49, %v3408_v22  ;;  %3643 = vst.msk [vmem:[%s5036_s28 + $0x10] sm:$0xff] %vm3444_vm14, %v3420_v39 }
 0x17a   : > { %3659 = vst.msk [vmem:[%s5036_s28 + $0x50] sm:$0xff] %vm3444_vm14, %v3436_v58  ;;  %v3441_v30 = vsel %vm3385_vm12, %v3357_v27, %v3413_v34  ;;  %vm3384_vm13 = vcmp.gt.f32.partialorder %v3356_v12, 0.0  ;;  %v3412_v6 = vmul.f32 -0.1, %v3356_v12 }
 0x17b   : > { %3664 = vst.msk [vmem:[%s5036_s28 + $0x68] sm:$0xff] %vm3444_vm14, %v3441_v30 }
 0x17c   : > { %v3440_v10 = vsel %vm3384_vm13, %v3356_v12, %v3412_v6 }
 0x17d   : > { %3663 = vst.msk [vmem:[%s5036_s28 + $0x60] sm:$0xff] %vm3444_vm14, %v3440_v10 }
 0x1c3   : > { %v3466_v2 = vpop.permute.xlu1 %3465 }
 0x1c4   : > { %v3452_v43 = vpop.permute.xlu0 %3451  ;;  %3646 = vst.msk [vmem:[%s5036_s28 + $0x18] sm:$0xff] %vm3455_vm15, %v3466_v2 }
 0x1c5   : > { %3457 = vst.msk [vmem:[%s5036_s28 + $0x8] sm:$0xff] %vm3455_vm15, %v3452_v43 }
 0x1c7   : > { %v3479_v38 = vpop.permute.xlu1 %3478 }
 0x1c8   : > { %v3450_v17 = vpop.permute.xlu0 %3449  ;;  %3650 = vst.msk [vmem:[%s5036_s28 + $0x28] sm:$0xff] %vm3455_vm15, %v3479_v38 }
 0x1c9   : > { %3456 = vst.msk [vmem:[%s5036_s28] sm:$0xff] %vm3455_vm15, %v3450_v17 }
 0x1cb   : > { %v3492_v31 = vpop.permute.xlu1 %3491 }
 0x1cc   : > { %v3477_v56 = vpop.permute.xlu0 %3476  ;;  %3654 = vst.msk [vmem:[%s5036_s28 + $0x38] sm:$0xff] %vm3455_vm15, %v3492_v31 }
 0x1cd   : > { %3649 = vst.msk [vmem:[%s5036_s28 + $0x20] sm:$0xff] %vm3455_vm15, %v3477_v56 }
 0x1cf   : > { %v3505_v20 = vpop.permute.xlu1 %3504 }
 0x1d0   : > { %v3490_v18 = vpop.permute.xlu0 %3489  ;;  %3658 = vst.msk [vmem:[%s5036_s28 + $0x48] sm:$0xff] %vm3455_vm15, %v3505_v20 }
 0x1d1   : > { %3653 = vst.msk [vmem:[%s5036_s28 + $0x30] sm:$0xff] %vm3455_vm15, %v3490_v18 }
 0x1d3   : > { %v3518_v55 = vpop.permute.xlu1 %3517 }
 0x1d4   : > { %v3503_v29 = vpop.permute.xlu0 %3502  ;;  %3662 = vst.msk [vmem:[%s5036_s28 + $0x58] sm:$0xff] %vm3455_vm15, %v3518_v55 }
 0x1d5   : > { %3657 = vst.msk [vmem:[%s5036_s28 + $0x40] sm:$0xff] %vm3455_vm15, %v3503_v29 }
 0x1d7   : > { %v3464_v37 = vpop.permute.xlu1 %3463 }
 0x1d8   : > { %v3516_v57 = vpop.permute.xlu0 %3515  ;;  %3645 = vst.msk [vmem:[%s5036_s28 + $0x10] sm:$0xff] %vm3455_vm15, %v3464_v37 }
 0x1d9   : > { %3661 = vst.msk [vmem:[%s5036_s28 + $0x50] sm:$0xff] %vm3455_vm15, %v3516_v57 }
 0x1db   : > { %v3531_v54 = vpop.permute.xlu1 %3530 }
 0x1dc   : > { %v3529_v50 = vpop.permute.xlu0 %3528  ;;  %3666 = vst.msk [vmem:[%s5036_s28 + $0x68] sm:$0xff] %vm3455_vm15, %v3531_v54 }
 0x1dd   : > { %3665 = vst.msk [vmem:[%s5036_s28 + $0x60] sm:$0xff] %vm3455_vm15, %v3529_v50 }
 0x1de PF: > { %s14_s17 = sadd.s32 1, %s4129_s17   ;;  %s5234_s15 = smov %s4125_s16 }
 0x1df   : > { %p11_p5 = scmp.ge.s32.totalorder %s14_s17, 4   ;;  %s5235_s16 = smov %s5237_s18 }
 0x1e1   :  { %13 = sbr.rel (!%p11_p5) target bundleno = 2 (0x2), region = 78 }

</bundles_post_ra>
